<compile_context>
chip_gen: v7x
topology: tpu7x:2x2x1
jax: 0.10.0
libtpu: 0.0.40
codegen_flags: <defaults>
</compile_context>

<pallas_src>
import functools

import jax
import jax.numpy as jnp
import numpy as np
from jax import lax
from jax.experimental import pallas as pl
from jax.experimental.pallas import tpu as pltpu

BN_EPS = 1e-5


def _round_up(x, m):
    return (x + m - 1) // m * m


# ---------------------------------------------------------------------------
# Pass 1: 3x3 conv as 9 shifted-slice MXU matmuls over the flattened padded
#         H*W axis + per-sample BatchNorm partial statistics (sum, sum_sq).
# ---------------------------------------------------------------------------
def _conv_stats_kernel(x_ref, w_ref, mask_ref, y_ref, stats_ref, acc_ref, *, mf, wp):
    """One grid step == one batch element.

    x_ref:     (1, R, Cin)    bf16  zero-padded input, H*W flattened row-major
    w_ref:     (9, Cin, Cpad) bf16  conv weight, tap-major (kh*3+kw)
    mask_ref:  (Mf, 1)        f32   1.0 on rows that are real conv outputs
    y_ref:     (1, Mf, Cpad)  f32   raw conv output (flattened, junk rows incl.)
    stats_ref: (1, 2, Cpad)   f32   [sum, sum_sq] over this sample's valid rows
    acc_ref:   (Mf, Cpad)     f32   VMEM accumulator scratch
    """
    # Conv: accumulate 9 taps; tap (kh, kw) is a contiguous slice of the
    # flattened input shifted by kh*Wp + kw rows.
    for kh in range(3):
        for kw in range(3):
            d = kh * wp + kw
            lhs = x_ref[0, d:d + mf, :]                          # (Mf, Cin) bf16
            contrib = jnp.dot(lhs, w_ref[kh * 3 + kw],
                              preferred_element_type=jnp.float32)
            if kh == 0 and kw == 0:
                acc_ref[...] = contrib
            else:
                acc_ref[...] += contrib

    y = acc_ref[...]                                             # (Mf, Cpad) f32
    y_ref[0] = y

    # One-pass BN statistics in f32; junk (wraparound) rows masked out.
    m = mask_ref[...]                                            # (Mf, 1) f32
    ym = y * m
    stats_ref[0, 0:1, :] = jnp.sum(ym, axis=0, keepdims=True)
    stats_ref[0, 1:2, :] = jnp.sum(ym * y, axis=0, keepdims=True)


# ---------------------------------------------------------------------------
# Pass 2: lane-dense per-channel affine  y * scale + shift.
# ---------------------------------------------------------------------------
def _affine_kernel(y_ref, scale_ref, shift_ref, o_ref):
    o_ref[0] = y_ref[0] * scale_ref[...] + shift_ref[...]


@functools.partial(jax.jit, static_argnames=("stride",))
def pre_conv_forward(x_nchw, weight_oihw, gamma, beta, *, stride):
    """Fused conv3x3(stride, pad=1, no bias) + training-mode BatchNorm2d.

    Interface matches PyTorch: x is NCHW f32, weight is OIHW, returns NCHW f32.
    """
    N, Cin, H, W = x_nchw.shape
    Cout = weight_oihw.shape[0]
    s = int(stride)
    Ho = (H + 2 - 3) // s + 1
    Wo = (W + 2 - 3) // s + 1
    Hp, Wp = H + 2, W + 2
    Hf = s * (Ho - 1) + 1            # stride-1 rows that must be covered
    Mf = Hf * Wp                     # flattened conv rows computed in-kernel
    Cpad = _round_up(Cout, 128)      # lane-dense output channels
    R = _round_up(Mf + 2 * Wp + 2, 8)  # flattened input rows incl. shift slack

    # ---- glue: NCHW -> NHWC, spatial zero-pad, flatten H*W, cast bf16 ----
    x = jnp.transpose(x_nchw, (0, 2, 3, 1)).astype(jnp.float32)       # NHWC
    xp = jnp.pad(x, ((0, 0), (1, 1), (1, 1), (0, 0)))                 # (N,Hp,Wp,Cin)
    x2 = xp.reshape(N, Hp * Wp, Cin)
    x2 = jnp.pad(x2, ((0, 0), (0, R - Hp * Wp), (0, 0))).astype(jnp.bfloat16)

    # weight (Cout, Cin, 3, 3) -> (9, Cin, Cpad), tap-major (kh, kw)
    w = jnp.transpose(weight_oihw, (2, 3, 1, 0)).reshape(9, Cin, Cout)
    w = jnp.pad(w, ((0, 0), (0, 0), (0, Cpad - Cout))).astype(jnp.bfloat16)

    # Static valid-row mask: flattened row p is a real output iff it maps to
    # some (oh, ow) of the strided output grid (excludes W-wraparound rows).
    p = np.arange(Mf)
    r, c = p // Wp, p % Wp
    valid = (r % s == 0) & (c % s == 0) & (c <= s * (Wo - 1))
    mask = jnp.asarray(valid.astype(np.float32)).reshape(Mf, 1)

    # ---- pass 1: conv + BN partial stats ----
    kernel1 = functools.partial(_conv_stats_kernel, mf=Mf, wp=Wp)
    y_full, part = pl.pallas_call(
        kernel1,
        out_shape=(jax.ShapeDtypeStruct((N, Mf, Cpad), jnp.float32),
                   jax.ShapeDtypeStruct((N, 2, Cpad), jnp.float32)),
        grid=(N,),
        in_specs=[pl.BlockSpec((1, R, Cin), lambda n: (n, 0, 0)),
                  pl.BlockSpec((9, Cin, Cpad), lambda n: (0, 0, 0)),
                  pl.BlockSpec((Mf, 1), lambda n: (0, 0))],
        out_specs=(pl.BlockSpec((1, Mf, Cpad), lambda n: (n, 0, 0)),
                   pl.BlockSpec((1, 2, Cpad), lambda n: (n, 0, 0))),
        scratch_shapes=[pltpu.VMEM((Mf, Cpad), jnp.float32)],
        compiler_params=pltpu.CompilerParams(
            dimension_semantics=("parallel",),
            vmem_limit_bytes=32 * 1024 * 1024),
    )(x2, w, mask)

    # ---- finalize BN stats into per-channel scale/shift (tiny (Cpad,) math) ----
    count = jnp.float32(N * Ho * Wo)
    tot = jnp.sum(part, axis=0)                     # (2, Cpad)
    mean = tot[0] / count
    var = jnp.maximum(tot[1] / count - mean * mean, 0.0)   # biased variance
    gamma_p = jnp.pad(gamma.astype(jnp.float32), (0, Cpad - Cout))
    beta_p = jnp.pad(beta.astype(jnp.float32), (0, Cpad - Cout))
    scale = gamma_p * lax.rsqrt(var + BN_EPS)
    shift = beta_p - mean * scale
    scale = scale.reshape(1, Cpad)
    shift = shift.reshape(1, Cpad)

    # ---- pass 2: apply affine, lane-dense tiles ----
    y_norm = pl.pallas_call(
        _affine_kernel,
        out_shape=jax.ShapeDtypeStruct((N, Mf, Cpad), jnp.float32),
        grid=(N,),
        in_specs=[pl.BlockSpec((1, Mf, Cpad), lambda n: (n, 0, 0)),
                  pl.BlockSpec((1, Cpad), lambda n: (0, 0)),
                  pl.BlockSpec((1, Cpad), lambda n: (0, 0))],
        out_specs=pl.BlockSpec((1, Mf, Cpad), lambda n: (n, 0, 0)),
        compiler_params=pltpu.CompilerParams(
            dimension_semantics=("parallel",),
            vmem_limit_bytes=32 * 1024 * 1024),
    )(y_full, scale, shift)

    # ---- extract valid output pixels / channels, back to NCHW ----
    y4 = y_norm.reshape(N, Hf, Wp, Cpad)
    out = y4[:, 0:Hf:s, 0:s * (Wo - 1) + 1:s, :Cout]          # (N, Ho, Wo, Cout)
    return jnp.transpose(out, (0, 3, 1, 2))


def _reference(x_nchw, weight_oihw, gamma, beta, stride):
    """Pure-JAX reference: conv (NCHW/OIHW) + training-mode BatchNorm2d.

    Inputs are rounded to bf16 first so the reference matches the kernel's
    bf16-input / f32-accumulation MXU math.
    """
    xb = x_nchw.astype(jnp.bfloat16).astype(jnp.float32)
    wb = weight_oihw.astype(jnp.bfloat16).astype(jnp.float32)
    y = lax.conv_general_dilated(
        xb, wb, window_strides=(stride, stride), padding=((1, 1), (1, 1)),
        dimension_numbers=("NCHW", "OIHW", "NCHW"),
        precision=lax.Precision.HIGHEST)
    mean = jnp.mean(y, axis=(0, 2, 3), keepdims=True)
    var = jnp.mean((y - mean) ** 2, axis=(0, 2, 3), keepdims=True)
    y_hat = (y - mean) * lax.rsqrt(var + BN_EPS)
    return y_hat * gamma.reshape(1, -1, 1, 1) + beta.reshape(1, -1, 1, 1)


if __name__ == "__main__":
    # Small shapes consistent with the module: N=2, Cin=4, H=W=16, Cout=8, stride=1.
    N, Cin, H, W = 2, 4, 16, 16
    Cout, stride = 8, 1

    key = jax.random.PRNGKey(0)
    kx, kw, kg, kb = jax.random.split(key, 4)
    x = jax.random.normal(kx, (N, Cin, H, W), dtype=jnp.float32)

    # PyTorch-style kaiming-uniform bound for conv weight; non-trivial BN affine
    # parameters to exercise the gamma/beta path.
    fan_in = Cin * 3 * 3
    bound = (1.0 / fan_in) ** 0.5
    weight = jax.random.uniform(kw, (Cout, Cin, 3, 3), jnp.float32, -bound, bound)
    gamma = jax.random.uniform(kg, (Cout,), jnp.float32, 0.5, 1.5)
    beta = 0.1 * jax.random.normal(kb, (Cout,), jnp.float32)

    out = jax.block_until_ready(
        pre_conv_forward(x, weight, gamma, beta, stride=stride))

    ref = _reference(x, weight, gamma, beta, stride)
    Ho = (H + 2 - 3) // stride + 1
    Wo = (W + 2 - 3) // stride + 1
    assert out.shape == ref.shape == (N, Cout, Ho, Wo), (out.shape, ref.shape)
    max_err = float(jnp.max(jnp.abs(out - ref)))
    assert jnp.allclose(out, ref, atol=1e-3, rtol=1e-3), \
        f"mismatch vs reference, max abs err={max_err}"

    print("KERNEL_OK")
</pallas_src>

<mosaic_0001>
module attributes {stable_mosaic.version = 11 : i64} {
  func.func @_conv_stats_kernel(%arg0: i32, %arg1: memref<1x328x4xbf16, #tpu.memory_space<vmem>>, %arg2: memref<9x4x128xbf16, #tpu.memory_space<vmem>>, %arg3: memref<288x1xf32, #tpu.memory_space<vmem>>, %arg4: memref<1x288x128xf32, #tpu.memory_space<vmem>>, %arg5: memref<1x2x128xf32, #tpu.memory_space<vmem>>, %arg6: memref<288x128xf32, #tpu.memory_space<vmem>>) attributes {dimension_semantics = [#tpu.dimension_semantics<parallel>], iteration_bounds = array<i64: 2>, scalar_prefetch = 0 : i64, scratch_operands = 1 : i64, tpu.core_type = #tpu.core_type<tc>, window_params = [{transform_indices = @transform_0, window_bounds = array<i64: 1, 328, 4>}, {pipeline_mode = #tpu.pipeline_mode<synchronous>, transform_indices = @transform_1, window_bounds = array<i64: 9, 4, 128>}, {pipeline_mode = #tpu.pipeline_mode<synchronous>, transform_indices = @transform_2, window_bounds = array<i64: 288, 1>}, {transform_indices = @transform_3, window_bounds = array<i64: 1, 288, 128>}, {transform_indices = @transform_4, window_bounds = array<i64: 1, 2, 128>}]} {
    %c0 = arith.constant 0 : index
    %c0_0 = arith.constant 0 : index
    %c0_1 = arith.constant 0 : index
    %0 = vector.load %arg1[%c0, %c0_0, %c0_1] : memref<1x328x4xbf16, #tpu.memory_space<vmem>>, vector<1x288x4xbf16>
    %1 = vector.shape_cast %0 : vector<1x288x4xbf16> to vector<288x4xbf16>
    %c0_2 = arith.constant 0 : index
    %c0_3 = arith.constant 0 : index
    %c0_4 = arith.constant 0 : index
    %2 = vector.load %arg2[%c0_2, %c0_3, %c0_4] : memref<9x4x128xbf16, #tpu.memory_space<vmem>>, vector<1x4x128xbf16>
    %3 = vector.shape_cast %2 : vector<1x4x128xbf16> to vector<4x128xbf16>
    %cst = arith.constant dense<0.000000e+00> : vector<288x128xf32>
    %4 = tpu.matmul %1, %3, %cst {dimension_numbers = #tpu.dot_dimension_numbers<[1], [0], [0], [1], [0, 0, 1, 1], [], []>} : vector<288x4xbf16>, vector<4x128xbf16>, vector<288x128xf32> -> vector<288x128xf32>
    %c0_5 = arith.constant 0 : index
    %c0_6 = arith.constant 0 : index
    %5 = vector.load %arg6[%c0_5, %c0_6] : memref<288x128xf32, #tpu.memory_space<vmem>>, vector<288x128xf32>
    tpu.vector_store %arg6[%c0_5, %c0_6], %4 {strides = array<i32>} : memref<288x128xf32, #tpu.memory_space<vmem>>, vector<288x128xf32>,
    %c0_7 = arith.constant 0 : index
    %c1 = arith.constant 1 : index
    %c0_8 = arith.constant 0 : index
    %6 = vector.load %arg1[%c0_7, %c1, %c0_8] : memref<1x328x4xbf16, #tpu.memory_space<vmem>>, vector<1x288x4xbf16>
    %7 = vector.shape_cast %6 : vector<1x288x4xbf16> to vector<288x4xbf16>
    %c1_9 = arith.constant 1 : index
    %c0_10 = arith.constant 0 : index
    %c0_11 = arith.constant 0 : index
    %8 = vector.load %arg2[%c1_9, %c0_10, %c0_11] : memref<9x4x128xbf16, #tpu.memory_space<vmem>>, vector<1x4x128xbf16>
    %9 = vector.shape_cast %8 : vector<1x4x128xbf16> to vector<4x128xbf16>
    %cst_12 = arith.constant dense<0.000000e+00> : vector<288x128xf32>
    %10 = tpu.matmul %7, %9, %cst_12 {dimension_numbers = #tpu.dot_dimension_numbers<[1], [0], [0], [1], [0, 0, 1, 1], [], []>} : vector<288x4xbf16>, vector<4x128xbf16>, vector<288x128xf32> -> vector<288x128xf32>
    %c0_13 = arith.constant 0 : index
    %c0_14 = arith.constant 0 : index
    %11 = vector.load %arg6[%c0_13, %c0_14] : memref<288x128xf32, #tpu.memory_space<vmem>>, vector<288x128xf32>
    %12 = arith.addf %11, %10 : vector<288x128xf32>
    %c0_15 = arith.constant 0 : index
    %c0_16 = arith.constant 0 : index
    %13 = vector.load %arg6[%c0_15, %c0_16] : memref<288x128xf32, #tpu.memory_space<vmem>>, vector<288x128xf32>
    tpu.vector_store %arg6[%c0_15, %c0_16], %12 {strides = array<i32>} : memref<288x128xf32, #tpu.memory_space<vmem>>, vector<288x128xf32>,
    %c0_17 = arith.constant 0 : index
    %c2 = arith.constant 2 : index
    %c0_18 = arith.constant 0 : index
    %14 = vector.load %arg1[%c0_17, %c2, %c0_18] : memref<1x328x4xbf16, #tpu.memory_space<vmem>>, vector<1x288x4xbf16>
    %15 = vector.shape_cast %14 : vector<1x288x4xbf16> to vector<288x4xbf16>
    %c2_19 = arith.constant 2 : index
    %c0_20 = arith.constant 0 : index
    %c0_21 = arith.constant 0 : index
    %16 = vector.load %arg2[%c2_19, %c0_20, %c0_21] : memref<9x4x128xbf16, #tpu.memory_space<vmem>>, vector<1x4x128xbf16>
    %17 = vector.shape_cast %16 : vector<1x4x128xbf16> to vector<4x128xbf16>
    %cst_22 = arith.constant dense<0.000000e+00> : vector<288x128xf32>
    %18 = tpu.matmul %15, %17, %cst_22 {dimension_numbers = #tpu.dot_dimension_numbers<[1], [0], [0], [1], [0, 0, 1, 1], [], []>} : vector<288x4xbf16>, vector<4x128xbf16>, vector<288x128xf32> -> vector<288x128xf32>
    %c0_23 = arith.constant 0 : index
    %c0_24 = arith.constant 0 : index
    %19 = vector.load %arg6[%c0_23, %c0_24] : memref<288x128xf32, #tpu.memory_space<vmem>>, vector<288x128xf32>
    %20 = arith.addf %19, %18 : vector<288x128xf32>
    %c0_25 = arith.constant 0 : index
    %c0_26 = arith.constant 0 : index
    %21 = vector.load %arg6[%c0_25, %c0_26] : memref<288x128xf32, #tpu.memory_space<vmem>>, vector<288x128xf32>
    tpu.vector_store %arg6[%c0_25, %c0_26], %20 {strides = array<i32>} : memref<288x128xf32, #tpu.memory_space<vmem>>, vector<288x128xf32>,
    %c0_27 = arith.constant 0 : index
    %c18 = arith.constant 18 : index
    %c0_28 = arith.constant 0 : index
    %22 = vector.load %arg1[%c0_27, %c18, %c0_28] : memref<1x328x4xbf16, #tpu.memory_space<vmem>>, vector<1x288x4xbf16>
    %23 = vector.shape_cast %22 : vector<1x288x4xbf16> to vector<288x4xbf16>
    %c3 = arith.constant 3 : index
    %c0_29 = arith.constant 0 : index
    %c0_30 = arith.constant 0 : index
    %24 = vector.load %arg2[%c3, %c0_29, %c0_30] : memref<9x4x128xbf16, #tpu.memory_space<vmem>>, vector<1x4x128xbf16>
    %25 = vector.shape_cast %24 : vector<1x4x128xbf16> to vector<4x128xbf16>
    %cst_31 = arith.constant dense<0.000000e+00> : vector<288x128xf32>
    %26 = tpu.matmul %23, %25, %cst_31 {dimension_numbers = #tpu.dot_dimension_numbers<[1], [0], [0], [1], [0, 0, 1, 1], [], []>} : vector<288x4xbf16>, vector<4x128xbf16>, vector<288x128xf32> -> vector<288x128xf32>
    %c0_32 = arith.constant 0 : index
    %c0_33 = arith.constant 0 : index
    %27 = vector.load %arg6[%c0_32, %c0_33] : memref<288x128xf32, #tpu.memory_space<vmem>>, vector<288x128xf32>
    %28 = arith.addf %27, %26 : vector<288x128xf32>
    %c0_34 = arith.constant 0 : index
    %c0_35 = arith.constant 0 : index
    %29 = vector.load %arg6[%c0_34, %c0_35] : memref<288x128xf32, #tpu.memory_space<vmem>>, vector<288x128xf32>
    tpu.vector_store %arg6[%c0_34, %c0_35], %28 {strides = array<i32>} : memref<288x128xf32, #tpu.memory_space<vmem>>, vector<288x128xf32>,
    %c0_36 = arith.constant 0 : index
    %c19 = arith.constant 19 : index
    %c0_37 = arith.constant 0 : index
    %30 = vector.load %arg1[%c0_36, %c19, %c0_37] : memref<1x328x4xbf16, #tpu.memory_space<vmem>>, vector<1x288x4xbf16>
    %31 = vector.shape_cast %30 : vector<1x288x4xbf16> to vector<288x4xbf16>
    %c4 = arith.constant 4 : index
    %c0_38 = arith.constant 0 : index
    %c0_39 = arith.constant 0 : index
    %32 = vector.load %arg2[%c4, %c0_38, %c0_39] : memref<9x4x128xbf16, #tpu.memory_space<vmem>>, vector<1x4x128xbf16>
    %33 = vector.shape_cast %32 : vector<1x4x128xbf16> to vector<4x128xbf16>
    %cst_40 = arith.constant dense<0.000000e+00> : vector<288x128xf32>
    %34 = tpu.matmul %31, %33, %cst_40 {dimension_numbers = #tpu.dot_dimension_numbers<[1], [0], [0], [1], [0, 0, 1, 1], [], []>} : vector<288x4xbf16>, vector<4x128xbf16>, vector<288x128xf32> -> vector<288x128xf32>
    %c0_41 = arith.constant 0 : index
    %c0_42 = arith.constant 0 : index
    %35 = vector.load %arg6[%c0_41, %c0_42] : memref<288x128xf32, #tpu.memory_space<vmem>>, vector<288x128xf32>
    %36 = arith.addf %35, %34 : vector<288x128xf32>
    %c0_43 = arith.constant 0 : index
    %c0_44 = arith.constant 0 : index
    %37 = vector.load %arg6[%c0_43, %c0_44] : memref<288x128xf32, #tpu.memory_space<vmem>>, vector<288x128xf32>
    tpu.vector_store %arg6[%c0_43, %c0_44], %36 {strides = array<i32>} : memref<288x128xf32, #tpu.memory_space<vmem>>, vector<288x128xf32>,
    %c0_45 = arith.constant 0 : index
    %c20 = arith.constant 20 : index
    %c0_46 = arith.constant 0 : index
    %38 = vector.load %arg1[%c0_45, %c20, %c0_46] : memref<1x328x4xbf16, #tpu.memory_space<vmem>>, vector<1x288x4xbf16>
    %39 = vector.shape_cast %38 : vector<1x288x4xbf16> to vector<288x4xbf16>
    %c5 = arith.constant 5 : index
    %c0_47 = arith.constant 0 : index
    %c0_48 = arith.constant 0 : index
    %40 = vector.load %arg2[%c5, %c0_47, %c0_48] : memref<9x4x128xbf16, #tpu.memory_space<vmem>>, vector<1x4x128xbf16>
    %41 = vector.shape_cast %40 : vector<1x4x128xbf16> to vector<4x128xbf16>
    %cst_49 = arith.constant dense<0.000000e+00> : vector<288x128xf32>
    %42 = tpu.matmul %39, %41, %cst_49 {dimension_numbers = #tpu.dot_dimension_numbers<[1], [0], [0], [1], [0, 0, 1, 1], [], []>} : vector<288x4xbf16>, vector<4x128xbf16>, vector<288x128xf32> -> vector<288x128xf32>
    %c0_50 = arith.constant 0 : index
    %c0_51 = arith.constant 0 : index
    %43 = vector.load %arg6[%c0_50, %c0_51] : memref<288x128xf32, #tpu.memory_space<vmem>>, vector<288x128xf32>
    %44 = arith.addf %43, %42 : vector<288x128xf32>
    %c0_52 = arith.constant 0 : index
    %c0_53 = arith.constant 0 : index
    %45 = vector.load %arg6[%c0_52, %c0_53] : memref<288x128xf32, #tpu.memory_space<vmem>>, vector<288x128xf32>
    tpu.vector_store %arg6[%c0_52, %c0_53], %44 {strides = array<i32>} : memref<288x128xf32, #tpu.memory_space<vmem>>, vector<288x128xf32>,
    %c0_54 = arith.constant 0 : index
    %c36 = arith.constant 36 : index
    %c0_55 = arith.constant 0 : index
    %46 = vector.load %arg1[%c0_54, %c36, %c0_55] : memref<1x328x4xbf16, #tpu.memory_space<vmem>>, vector<1x288x4xbf16>
    %47 = vector.shape_cast %46 : vector<1x288x4xbf16> to vector<288x4xbf16>
    %c6 = arith.constant 6 : index
    %c0_56 = arith.constant 0 : index
    %c0_57 = arith.constant 0 : index
    %48 = vector.load %arg2[%c6, %c0_56, %c0_57] : memref<9x4x128xbf16, #tpu.memory_space<vmem>>, vector<1x4x128xbf16>
    %49 = vector.shape_cast %48 : vector<1x4x128xbf16> to vector<4x128xbf16>
    %cst_58 = arith.constant dense<0.000000e+00> : vector<288x128xf32>
    %50 = tpu.matmul %47, %49, %cst_58 {dimension_numbers = #tpu.dot_dimension_numbers<[1], [0], [0], [1], [0, 0, 1, 1], [], []>} : vector<288x4xbf16>, vector<4x128xbf16>, vector<288x128xf32> -> vector<288x128xf32>
    %c0_59 = arith.constant 0 : index
    %c0_60 = arith.constant 0 : index
    %51 = vector.load %arg6[%c0_59, %c0_60] : memref<288x128xf32, #tpu.memory_space<vmem>>, vector<288x128xf32>
    %52 = arith.addf %51, %50 : vector<288x128xf32>
    %c0_61 = arith.constant 0 : index
    %c0_62 = arith.constant 0 : index
    %53 = vector.load %arg6[%c0_61, %c0_62] : memref<288x128xf32, #tpu.memory_space<vmem>>, vector<288x128xf32>
    tpu.vector_store %arg6[%c0_61, %c0_62], %52 {strides = array<i32>} : memref<288x128xf32, #tpu.memory_space<vmem>>, vector<288x128xf32>,
    %c0_63 = arith.constant 0 : index
    %c37 = arith.constant 37 : index
    %c0_64 = arith.constant 0 : index
    %54 = vector.load %arg1[%c0_63, %c37, %c0_64] : memref<1x328x4xbf16, #tpu.memory_space<vmem>>, vector<1x288x4xbf16>
    %55 = vector.shape_cast %54 : vector<1x288x4xbf16> to vector<288x4xbf16>
    %c7 = arith.constant 7 : index
    %c0_65 = arith.constant 0 : index
    %c0_66 = arith.constant 0 : index
    %56 = vector.load %arg2[%c7, %c0_65, %c0_66] : memref<9x4x128xbf16, #tpu.memory_space<vmem>>, vector<1x4x128xbf16>
    %57 = vector.shape_cast %56 : vector<1x4x128xbf16> to vector<4x128xbf16>
    %cst_67 = arith.constant dense<0.000000e+00> : vector<288x128xf32>
    %58 = tpu.matmul %55, %57, %cst_67 {dimension_numbers = #tpu.dot_dimension_numbers<[1], [0], [0], [1], [0, 0, 1, 1], [], []>} : vector<288x4xbf16>, vector<4x128xbf16>, vector<288x128xf32> -> vector<288x128xf32>
    %c0_68 = arith.constant 0 : index
    %c0_69 = arith.constant 0 : index
    %59 = vector.load %arg6[%c0_68, %c0_69] : memref<288x128xf32, #tpu.memory_space<vmem>>, vector<288x128xf32>
    %60 = arith.addf %59, %58 : vector<288x128xf32>
    %c0_70 = arith.constant 0 : index
    %c0_71 = arith.constant 0 : index
    %61 = vector.load %arg6[%c0_70, %c0_71] : memref<288x128xf32, #tpu.memory_space<vmem>>, vector<288x128xf32>
    tpu.vector_store %arg6[%c0_70, %c0_71], %60 {strides = array<i32>} : memref<288x128xf32, #tpu.memory_space<vmem>>, vector<288x128xf32>,
    %c0_72 = arith.constant 0 : index
    %c38 = arith.constant 38 : index
    %c0_73 = arith.constant 0 : index
    %62 = vector.load %arg1[%c0_72, %c38, %c0_73] : memref<1x328x4xbf16, #tpu.memory_space<vmem>>, vector<1x288x4xbf16>
    %63 = vector.shape_cast %62 : vector<1x288x4xbf16> to vector<288x4xbf16>
    %c8 = arith.constant 8 : index
    %c0_74 = arith.constant 0 : index
    %c0_75 = arith.constant 0 : index
    %64 = vector.load %arg2[%c8, %c0_74, %c0_75] : memref<9x4x128xbf16, #tpu.memory_space<vmem>>, vector<1x4x128xbf16>
    %65 = vector.shape_cast %64 : vector<1x4x128xbf16> to vector<4x128xbf16>
    %cst_76 = arith.constant dense<0.000000e+00> : vector<288x128xf32>
    %66 = tpu.matmul %63, %65, %cst_76 {dimension_numbers = #tpu.dot_dimension_numbers<[1], [0], [0], [1], [0, 0, 1, 1], [], []>} : vector<288x4xbf16>, vector<4x128xbf16>, vector<288x128xf32> -> vector<288x128xf32>
    %c0_77 = arith.constant 0 : index
    %c0_78 = arith.constant 0 : index
    %67 = vector.load %arg6[%c0_77, %c0_78] : memref<288x128xf32, #tpu.memory_space<vmem>>, vector<288x128xf32>
    %68 = arith.addf %67, %66 : vector<288x128xf32>
    %c0_79 = arith.constant 0 : index
    %c0_80 = arith.constant 0 : index
    %69 = vector.load %arg6[%c0_79, %c0_80] : memref<288x128xf32, #tpu.memory_space<vmem>>, vector<288x128xf32>
    tpu.vector_store %arg6[%c0_79, %c0_80], %68 {strides = array<i32>} : memref<288x128xf32, #tpu.memory_space<vmem>>, vector<288x128xf32>,
    %c0_81 = arith.constant 0 : index
    %c0_82 = arith.constant 0 : index
    %70 = vector.load %arg6[%c0_81, %c0_82] : memref<288x128xf32, #tpu.memory_space<vmem>>, vector<288x128xf32>
    %c0_83 = arith.constant 0 : index
    %c0_84 = arith.constant 0 : index
    %c0_85 = arith.constant 0 : index
    %71 = vector.load %arg4[%c0_83, %c0_84, %c0_85] : memref<1x288x128xf32, #tpu.memory_space<vmem>>, vector<1x288x128xf32>
    %72 = vector.shape_cast %71 : vector<1x288x128xf32> to vector<288x128xf32>
    %73 = vector.shape_cast %70 : vector<288x128xf32> to vector<1x288x128xf32>
    tpu.vector_store %arg4[%c0_83, %c0_84, %c0_85], %73 {strides = array<i32>} : memref<1x288x128xf32, #tpu.memory_space<vmem>>, vector<1x288x128xf32>,
    %c0_86 = arith.constant 0 : index
    %c0_87 = arith.constant 0 : index
    %74 = vector.load %arg3[%c0_86, %c0_87] : memref<288x1xf32, #tpu.memory_space<vmem>>, vector<288x1xf32>
    %75 = vector.broadcast %74 : vector<288x1xf32> to vector<288x128xf32>
    %76 = arith.mulf %70, %75 : vector<288x128xf32>
    %cst_88 = arith.constant dense<0.000000e+00> : vector<128xf32>
    %77 = vector.multi_reduction <add>, %76, %cst_88 [0] : vector<288x128xf32> to vector<128xf32>
    %78 = vector.shape_cast %77 : vector<128xf32> to vector<1x128xf32>
    %c0_89 = arith.constant 0 : index
    %c0_90 = arith.constant 0 : index
    %c0_91 = arith.constant 0 : index
    %79 = vector.load %arg5[%c0_89, %c0_90, %c0_91] : memref<1x2x128xf32, #tpu.memory_space<vmem>>, vector<1x1x128xf32>
    %80 = vector.shape_cast %79 : vector<1x1x128xf32> to vector<1x128xf32>
    %81 = vector.shape_cast %78 : vector<1x128xf32> to vector<1x1x128xf32>
    tpu.vector_store %arg5[%c0_89, %c0_90, %c0_91], %81 {strides = array<i32>} : memref<1x2x128xf32, #tpu.memory_space<vmem>>, vector<1x1x128xf32>,
    %82 = arith.mulf %76, %70 : vector<288x128xf32>
    %cst_92 = arith.constant dense<0.000000e+00> : vector<128xf32>
    %83 = vector.multi_reduction <add>, %82, %cst_92 [0] : vector<288x128xf32> to vector<128xf32>
    %84 = vector.shape_cast %83 : vector<128xf32> to vector<1x128xf32>
    %c0_93 = arith.constant 0 : index
    %c1_94 = arith.constant 1 : index
    %c0_95 = arith.constant 0 : index
    %85 = vector.load %arg5[%c0_93, %c1_94, %c0_95] : memref<1x2x128xf32, #tpu.memory_space<vmem>>, vector<1x1x128xf32>
    %86 = vector.shape_cast %85 : vector<1x1x128xf32> to vector<1x128xf32>
    %87 = vector.shape_cast %84 : vector<1x128xf32> to vector<1x1x128xf32>
    tpu.vector_store %arg5[%c0_93, %c1_94, %c0_95], %87 {strides = array<i32>} : memref<1x2x128xf32, #tpu.memory_space<vmem>>, vector<1x1x128xf32>,
    return
  }
  func.func @transform_0(%arg0: i32) -> (i32, i32, i32) {
    %c0_i32 = arith.constant 0 : i32
    %c0_i32_0 = arith.constant 0 : i32
    %c0_i32_1 = arith.constant 0 : i32
    return %arg0, %c0_i32, %c0_i32_0 : i32, i32, i32
  }
  func.func @transform_1(%arg0: i32) -> (i32, i32, i32) {
    %c0_i32 = arith.constant 0 : i32
    %c0_i32_0 = arith.constant 0 : i32
    %c0_i32_1 = arith.constant 0 : i32
    %c0_i32_2 = arith.constant 0 : i32
    return %c0_i32, %c0_i32_0, %c0_i32_1 : i32, i32, i32
  }
  func.func @transform_2(%arg0: i32) -> (i32, i32) {
    %c0_i32 = arith.constant 0 : i32
    %c0_i32_0 = arith.constant 0 : i32
    %c0_i32_1 = arith.constant 0 : i32
    return %c0_i32, %c0_i32_0 : i32, i32
  }
  func.func @transform_3(%arg0: i32) -> (i32, i32, i32) {
    %c0_i32 = arith.constant 0 : i32
    %c0_i32_0 = arith.constant 0 : i32
    %c0_i32_1 = arith.constant 0 : i32
    return %arg0, %c0_i32, %c0_i32_0 : i32, i32, i32
  }
  func.func @transform_4(%arg0: i32) -> (i32, i32, i32) {
    %c0_i32 = arith.constant 0 : i32
    %c0_i32_0 = arith.constant 0 : i32
    %c0_i32_1 = arith.constant 0 : i32
    return %arg0, %c0_i32, %c0_i32_0 : i32, i32, i32
  }
}

module attributes {stable_mosaic.version = 11 : i64} {
  func.func @_affine_kernel(%arg0: i32, %arg1: memref<1x288x128xf32, #tpu.memory_space<vmem>>, %arg2: memref<1x128xf32, #tpu.memory_space<vmem>>, %arg3: memref<1x128xf32, #tpu.memory_space<vmem>>, %arg4: memref<1x288x128xf32, #tpu.memory_space<vmem>>) attributes {dimension_semantics = [#tpu.dimension_semantics<parallel>], iteration_bounds = array<i64: 2>, scalar_prefetch = 0 : i64, scratch_operands = 0 : i64, tpu.core_type = #tpu.core_type<tc>, window_params = [{transform_indices = @transform_0, window_bounds = array<i64: 1, 288, 128>}, {pipeline_mode = #tpu.pipeline_mode<synchronous>, transform_indices = @transform_1, window_bounds = array<i64: 1, 128>}, {pipeline_mode = #tpu.pipeline_mode<synchronous>, transform_indices = @transform_2, window_bounds = array<i64: 1, 128>}, {transform_indices = @transform_3, window_bounds = array<i64: 1, 288, 128>}]} {
    %c0 = arith.constant 0 : index
    %c0_0 = arith.constant 0 : index
    %c0_1 = arith.constant 0 : index
    %0 = vector.load %arg1[%c0, %c0_0, %c0_1] : memref<1x288x128xf32, #tpu.memory_space<vmem>>, vector<1x288x128xf32>
    %1 = vector.shape_cast %0 : vector<1x288x128xf32> to vector<288x128xf32>
    %c0_2 = arith.constant 0 : index
    %c0_3 = arith.constant 0 : index
    %2 = vector.load %arg2[%c0_2, %c0_3] : memref<1x128xf32, #tpu.memory_space<vmem>>, vector<1x128xf32>
    %3 = vector.broadcast %2 : vector<1x128xf32> to vector<288x128xf32>
    %4 = arith.mulf %1, %3 : vector<288x128xf32>
    %c0_4 = arith.constant 0 : index
    %c0_5 = arith.constant 0 : index
    %5 = vector.load %arg3[%c0_4, %c0_5] : memref<1x128xf32, #tpu.memory_space<vmem>>, vector<1x128xf32>
    %6 = vector.broadcast %5 : vector<1x128xf32> to vector<288x128xf32>
    %7 = arith.addf %4, %6 : vector<288x128xf32>
    %c0_6 = arith.constant 0 : index
    %c0_7 = arith.constant 0 : index
    %c0_8 = arith.constant 0 : index
    %8 = vector.load %arg4[%c0_6, %c0_7, %c0_8] : memref<1x288x128xf32, #tpu.memory_space<vmem>>, vector<1x288x128xf32>
    %9 = vector.shape_cast %8 : vector<1x288x128xf32> to vector<288x128xf32>
    %10 = vector.shape_cast %7 : vector<288x128xf32> to vector<1x288x128xf32>
    tpu.vector_store %arg4[%c0_6, %c0_7, %c0_8], %10 {strides = array<i32>} : memref<1x288x128xf32, #tpu.memory_space<vmem>>, vector<1x288x128xf32>,
    return
  }
  func.func @transform_0(%arg0: i32) -> (i32, i32, i32) {
    %c0_i32 = arith.constant 0 : i32
    %c0_i32_0 = arith.constant 0 : i32
    %c0_i32_1 = arith.constant 0 : i32
    return %arg0, %c0_i32, %c0_i32_0 : i32, i32, i32
  }
  func.func @transform_1(%arg0: i32) -> (i32, i32) {
    %c0_i32 = arith.constant 0 : i32
    %c0_i32_0 = arith.constant 0 : i32
    %c0_i32_1 = arith.constant 0 : i32
    return %c0_i32, %c0_i32_0 : i32, i32
  }
  func.func @transform_2(%arg0: i32) -> (i32, i32) {
    %c0_i32 = arith.constant 0 : i32
    %c0_i32_0 = arith.constant 0 : i32
    %c0_i32_1 = arith.constant 0 : i32
    return %c0_i32, %c0_i32_0 : i32, i32
  }
  func.func @transform_3(%arg0: i32) -> (i32, i32, i32) {
    %c0_i32 = arith.constant 0 : i32
    %c0_i32_0 = arith.constant 0 : i32
    %c0_i32_1 = arith.constant 0 : i32
    return %arg0, %c0_i32, %c0_i32_0 : i32, i32, i32
  }
}

</mosaic_0001>

<bundles_post_ra>
// kernel: pre_conv_forward.3
= control target key start
LH: loop header
LB: loop body
LE: loop exit
PB: predicated region body
PF: predicated region fallthrough
CT: control target
= control target key end

     0   :  { %s432_s12 = smov 0   ;;  %s607_s0 = inlined_call_operand.vmem [shape: f32[2,288,128], index: 0, kind: input, shape index: {}]   ;;  %s608_s1 = inlined_call_operand.vmem [shape: f32[1,128], index: 1, kind: input, shape index: {}]   ;;  %s609_s2 = inlined_call_operand.vmem [shape: f32[1,128], index: 2, kind: input, shape index: {}]   ;;  %s610_s3 = inlined_call_operand.vmem [shape: f32[2,288,128], index: 3, kind: output, shape index: {}]  }
   0x1 LB: > { %s384_s13 = sadd.s32 4294967295, %s410_s12   ;;  %p388_p0 = scmp.ge.s32.totalorder %s410_s12, 1  ;;  %s410_s12 = sphi %s432_s12, %s13_s12  }
   0x2   : > { %p137_p1 = scmp.lt.s32.totalorder %s410_s12, 3 }
   0x4   : > { %p138_p2 = pnand %p388_p0, %p137_p1 }
   0x5   : > { %p161_p3 = scmp.lt.s32.totalorder (!%p138_p2), %s384_s13, 1  ;;  %v443_v0 = vld [vmem:[%s608_s1] ss:$0 sm:$0xff] (!%p138_p2) }
   0x6   : > { %141 = sbr.rel (%p138_p2) target bundleno = 43 (0x2b), region = 32  ;;  %v453_v1 = vld [vmem:[%s609_s2] ss:$0 sm:$0xff] (!%p138_p2) }
   0xd   : > { %s612_s13 = smov (!%p161_p3, %s384_s13), 1 }
   0xe   : > { %s395_s14 = smul.u32 288, %s612_s13 }
  0x10   : > { %s448_s19 = scalar_lea.vmem %s607_s0, %s395_s14  ;;  %s467_s24 = scalar_lea.vmem %s610_s3, %s395_s14 }
  0x11   : > { %v171_v2 = vld [vmem:[%s448_s19] sm:$0xff]  ;;  %v172_v3 = vld [vmem:[%s448_s19 + $0x8] sm:$0xff]  ;;  %v173_v4 = vld [vmem:[%s448_s19 + $0x10] sm:$0xff] }
  0x12   : > { %v214_v5 = vmul.f32 %v443_v0, %v171_v2  ;;  %v215_v6 = vmul.f32 %v443_v0, %v172_v3  ;;  %v216_v7 = vmul.f32 %v443_v0, %v173_v4  ;;  %v174_v8 = vld [vmem:[%s448_s19 + $0x18] sm:$0xff]  ;;  %v175_v9 = vld [vmem:[%s448_s19 + $0x20] sm:$0xff]  ;;  %v176_v10 = vld [vmem:[%s448_s19 + $0x28] sm:$0xff] }
  0x13   : > { %v217_v11 = vmul.f32 %v443_v0, %v174_v8  ;;  %v218_v12 = vmul.f32 %v443_v0, %v175_v9  ;;  %v219_v13 = vmul.f32 %v443_v0, %v176_v10  ;;  %v177_v14 = vld [vmem:[%s448_s19 + $0x30] sm:$0xff]  ;;  %v178_v15 = vld [vmem:[%s448_s19 + $0x38] sm:$0xff]  ;;  %v179_v16 = vld [vmem:[%s448_s19 + $0x40] sm:$0xff] }
  0x14   : > { %v257_v17 = vadd.f32 %v453_v1, %v214_v5  ;;  %v258_v18 = vadd.f32 %v453_v1, %v215_v6  ;;  %v259_v19 = vadd.f32 %v453_v1, %v216_v7  ;;  %v220_v20 = vmul.f32 %v443_v0, %v177_v14  ;;  %v180_v21 = vld [vmem:[%s448_s19 + $0x48] sm:$0xff]  ;;  %v181_v22 = vld [vmem:[%s448_s19 + $0x50] sm:$0xff]  ;;  %v182_v23 = vld [vmem:[%s448_s19 + $0x58] sm:$0xff] }
  0x15   : > { %v260_v24 = vadd.f32 %v453_v1, %v217_v11  ;;  %v261_v25 = vadd.f32 %v453_v1, %v218_v12  ;;  %v262_v26 = vadd.f32 %v453_v1, %v219_v13  ;;  %v221_v27 = vmul.f32 %v443_v0, %v178_v15  ;;  %v183_v28 = vld [vmem:[%s448_s19 + $0x60] sm:$0xff]  ;;  %v184_v29 = vld [vmem:[%s448_s19 + $0x68] sm:$0xff]  ;;  %v185_v30 = vld [vmem:[%s448_s19 + $0x70] sm:$0xff] }
  0x16   : > { %293 = vst [vmem:[%s467_s24] sm:$0xff] %v257_v17  ;;  %294 = vst [vmem:[%s467_s24 + $0x8] sm:$0xff] %v258_v18  ;;  %v263_v31 = vadd.f32 %v453_v1, %v220_v20  ;;  %v222_v32 = vmul.f32 %v443_v0, %v179_v16  ;;  %v223_v33 = vmul.f32 %v443_v0, %v180_v21  ;;  %v186_v35 = vld [vmem:[%s448_s19 + $0x78] sm:$0xff]  ;;  %v187_v40 = vld [vmem:[%s448_s19 + $0x80] sm:$0xff] }
  0x17   : > { %295 = vst [vmem:[%s467_s24 + $0x10] sm:$0xff] %v259_v19  ;;  %v224_v34 = vmul.f32 %v443_v0, %v181_v22  ;;  %296 = vst [vmem:[%s467_s24 + $0x18] sm:$0xff] %v260_v24  ;;  %v264_v36 = vadd.f32 %v453_v1, %v221_v27  ;;  %v225_v37 = vmul.f32 %v443_v0, %v182_v23  ;;  %v188_v41 = vld [vmem:[%s448_s19 + $0x88] sm:$0xff]  ;;  %v189_v42 = vld [vmem:[%s448_s19 + $0x90] sm:$0xff] }
  0x18   : > { %297 = vst [vmem:[%s467_s24 + $0x20] sm:$0xff] %v261_v25  ;;  %298 = vst [vmem:[%s467_s24 + $0x28] sm:$0xff] %v262_v26  ;;  %v226_v38 = vmul.f32 %v443_v0, %v183_v28  ;;  %v227_v39 = vmul.f32 %v443_v0, %v184_v29  ;;  %v265_v43 = vadd.f32 %v453_v1, %v222_v32  ;;  %v190_v47 = vld [vmem:[%s448_s19 + $0x98] sm:$0xff]  ;;  %v191_v48 = vld [vmem:[%s448_s19 + $0xa0] sm:$0xff] }
  0x19   : > { %299 = vst [vmem:[%s467_s24 + $0x30] sm:$0xff] %v263_v31  ;;  %v266_v44 = vadd.f32 %v453_v1, %v223_v33  ;;  %v267_v45 = vadd.f32 %v453_v1, %v224_v34  ;;  %v228_v46 = vmul.f32 %v443_v0, %v185_v30  ;;  %v192_v49 = vld [vmem:[%s448_s19 + $0xa8] sm:$0xff]  ;;  %300 = vst [vmem:[%s467_s24 + $0x38] sm:$0xff] %v264_v36  ;;  %v193_v54 = vld [vmem:[%s448_s19 + $0xb0] sm:$0xff] }
  0x1a   : > { %v268_v50 = vadd.f32 %v453_v1, %v225_v37  ;;  %v269_v51 = vadd.f32 %v453_v1, %v226_v38  ;;  %v270_v52 = vadd.f32 %v453_v1, %v227_v39  ;;  %v229_v53 = vmul.f32 %v443_v0, %v186_v35  ;;  %301 = vst [vmem:[%s467_s24 + $0x40] sm:$0xff] %v265_v43  ;;  %v194_v59 = vld [vmem:[%s448_s19 + $0xb8] sm:$0xff]  ;;  %v195_v2 = vld [vmem:[%s448_s19 + $0xc0] sm:$0xff]  ;;  %v196_v3 = vld [vmem:[%s448_s19 + $0xc8] sm:$0xff] }
  0x1b   : > { %302 = vst [vmem:[%s467_s24 + $0x48] sm:$0xff] %v266_v44  ;;  %303 = vst [vmem:[%s467_s24 + $0x50] sm:$0xff] %v267_v45  ;;  %v271_v55 = vadd.f32 %v453_v1, %v228_v46  ;;  %v230_v56 = vmul.f32 %v443_v0, %v187_v40  ;;  %v231_v57 = vmul.f32 %v443_v0, %v188_v41  ;;  %v197_v4 = vld [vmem:[%s448_s19 + $0xd0] sm:$0xff]  ;;  %v198_v9 = vld [vmem:[%s448_s19 + $0xd8] sm:$0xff] }
  0x1c   : > { %v232_v58 = vmul.f32 %v443_v0, %v189_v42  ;;  %304 = vst [vmem:[%s467_s24 + $0x58] sm:$0xff] %v268_v50  ;;  %305 = vst [vmem:[%s467_s24 + $0x60] sm:$0xff] %v269_v51  ;;  %v272_v60 = vadd.f32 %v453_v1, %v229_v53  ;;  %v233_v61 = vmul.f32 %v443_v0, %v190_v47  ;;  %v199_v10 = vld [vmem:[%s448_s19 + $0xe0] sm:$0xff]  ;;  %v200_v11 = vld [vmem:[%s448_s19 + $0xe8] sm:$0xff] }
  0x1d   : > { %306 = vst [vmem:[%s467_s24 + $0x68] sm:$0xff] %v270_v52  ;;  %v234_v62 = vmul.f32 %v443_v0, %v191_v48  ;;  %v235_v63 = vmul.f32 %v443_v0, %v192_v49  ;;  %307 = vst [vmem:[%s467_s24 + $0x70] sm:$0xff] %v271_v55  ;;  %v273_v5 = vadd.f32 %v453_v1, %v230_v56  ;;  %v201_v16 = vld [vmem:[%s448_s19 + $0xf0] sm:$0xff]  ;;  %v202_v21 = vld [vmem:[%s448_s19 + $0xf8] sm:$0xff] }
  0x1e   : > { %v274_v6 = vadd.f32 %v453_v1, %v231_v57  ;;  %v275_v7 = vadd.f32 %v453_v1, %v232_v58  ;;  %v236_v8 = vmul.f32 %v443_v0, %v193_v54  ;;  %308 = vst [vmem:[%s467_s24 + $0x78] sm:$0xff] %v272_v60  ;;  %v276_v12 = vadd.f32 %v453_v1, %v233_v61  ;;  %v203_v26 = vld [vmem:[%s448_s19 + $0x100] sm:$0xff]  ;;  %v204_v27 = vld [vmem:[%s448_s19 + $0x108] sm:$0xff]  ;;  %v205_v28 = vld [vmem:[%s448_s19 + $0x110] sm:$0xff] }
  0x1f   : > { %v277_v13 = vadd.f32 %v453_v1, %v234_v62  ;;  %v278_v14 = vadd.f32 %v453_v1, %v235_v63  ;;  %v237_v15 = vmul.f32 %v443_v0, %v194_v59  ;;  %309 = vst [vmem:[%s467_s24 + $0x80] sm:$0xff] %v273_v5  ;;  %v238_v18 = vmul.f32 %v443_v0, %v195_v2  ;;  %v206_v33 = vld [vmem:[%s448_s19 + $0x118] sm:$0xff] }
  0x20   : > { %310 = vst [vmem:[%s467_s24 + $0x88] sm:$0xff] %v274_v6  ;;  %311 = vst [vmem:[%s467_s24 + $0x90] sm:$0xff] %v275_v7  ;;  %v279_v17 = vadd.f32 %v453_v1, %v236_v8  ;;  %v239_v19 = vmul.f32 %v443_v0, %v196_v3  ;;  %v240_v20 = vmul.f32 %v443_v0, %v197_v4 }
  0x21   : > { %312 = vst [vmem:[%s467_s24 + $0x98] sm:$0xff] %v276_v12  ;;  %313 = vst [vmem:[%s467_s24 + $0xa0] sm:$0xff] %v277_v13  ;;  %v280_v22 = vadd.f32 %v453_v1, %v237_v15  ;;  %v241_v23 = vmul.f32 %v443_v0, %v198_v9  ;;  %v242_v24 = vmul.f32 %v443_v0, %v199_v10 }
  0x22   : > { %314 = vst [vmem:[%s467_s24 + $0xa8] sm:$0xff] %v278_v14  ;;  %v243_v25 = vmul.f32 %v443_v0, %v200_v11  ;;  %315 = vst [vmem:[%s467_s24 + $0xb0] sm:$0xff] %v279_v17  ;;  %v281_v29 = vadd.f32 %v453_v1, %v238_v18  ;;  %v282_v30 = vadd.f32 %v453_v1, %v239_v19 }
  0x23   : > { %v283_v31 = vadd.f32 %v453_v1, %v240_v20  ;;  %v244_v32 = vmul.f32 %v443_v0, %v201_v16  ;;  %316 = vst [vmem:[%s467_s24 + $0xb8] sm:$0xff] %v280_v22  ;;  %v284_v34 = vadd.f32 %v453_v1, %v241_v23  ;;  %v285_v35 = vadd.f32 %v453_v1, %v242_v24 }
  0x24   : > { %v286_v36 = vadd.f32 %v453_v1, %v243_v25  ;;  %v245_v37 = vmul.f32 %v443_v0, %v202_v21  ;;  %317 = vst [vmem:[%s467_s24 + $0xc0] sm:$0xff] %v281_v29  ;;  %318 = vst [vmem:[%s467_s24 + $0xc8] sm:$0xff] %v282_v30  ;;  %v246_v39 = vmul.f32 %v443_v0, %v203_v26 }
  0x25   : > { %319 = vst [vmem:[%s467_s24 + $0xd0] sm:$0xff] %v283_v31  ;;  %v287_v38 = vadd.f32 %v453_v1, %v244_v32  ;;  %v247_v40 = vmul.f32 %v443_v0, %v204_v27  ;;  %v248_v41 = vmul.f32 %v443_v0, %v205_v28  ;;  %320 = vst [vmem:[%s467_s24 + $0xd8] sm:$0xff] %v284_v34 }
  0x26   : > { %321 = vst [vmem:[%s467_s24 + $0xe0] sm:$0xff] %v285_v35  ;;  %322 = vst [vmem:[%s467_s24 + $0xe8] sm:$0xff] %v286_v36  ;;  %v288_v42 = vadd.f32 %v453_v1, %v245_v37  ;;  %v249_v43 = vmul.f32 %v443_v0, %v206_v33  ;;  %v289_v44 = vadd.f32 %v453_v1, %v246_v39 }
  0x27   : > { %323 = vst [vmem:[%s467_s24 + $0xf0] sm:$0xff] %v287_v38  ;;  %v290_v45 = vadd.f32 %v453_v1, %v247_v40  ;;  %v291_v46 = vadd.f32 %v453_v1, %v248_v41 }
  0x28   : > { %324 = vst [vmem:[%s467_s24 + $0xf8] sm:$0xff] %v288_v42  ;;  %v292_v47 = vadd.f32 %v453_v1, %v249_v43  ;;  %325 = vst [vmem:[%s467_s24 + $0x100] sm:$0xff] %v289_v44 }
  0x29   : > { %326 = vst [vmem:[%s467_s24 + $0x108] sm:$0xff] %v290_v45  ;;  %327 = vst [vmem:[%s467_s24 + $0x110] sm:$0xff] %v291_v46 }
  0x2a   : > { %328 = vst [vmem:[%s467_s24 + $0x118] sm:$0xff] %v292_v47 }
  0x2b PF: > { %s13_s12 = sadd.s32 1, %s410_s12  }
  0x2c   : > { %p10_p4 = scmp.ge.s32.totalorder %s13_s12, 4  }
  0x2e   :  { %12 = sbr.rel (!%p10_p4) target bundleno = 1 (0x1), region = 62 }

// kernel: pre_conv_forward.2
= control target key start
LH: loop header
LB: loop body
LE: loop exit
PB: predicated region body
PF: predicated region fallthrough
CT: control target
= control target key end

     0   :  { %s6991_s15 = smov 0   ;;  %s7852_s0 = inlined_call_operand.vmem [shape: bf16[2,328,4], index: 0, kind: input, shape index: {}]   ;;  %s7853_s1 = inlined_call_operand.vmem [shape: bf16[9,4,128], index: 1, kind: input, shape index: {}]   ;;  %s7854_s2 = inlined_call_operand.vmem [shape: f32[288,1], index: 2, kind: input, shape index: {}]   ;;  %s7855_s3 = inlined_call_operand.vmem [shape: f32[2,288,128], index: 3, kind: output, shape index: {0}]   ;;  %s7856_s4 = inlined_call_operand.vmem [shape: f32[2,2,128], index: 4, kind: output, shape index: {1}]  }
   0x1 LB: > { %s5610_s16 = sadd.s32 4294967295, %s6963_s15   ;;  %p5614_p0 = scmp.ge.s32.totalorder %s6963_s15, 1  ;;  %s6963_s15 = sphi %s6991_s15, %s15_s15  }
   0x2   : > { %p165_p1 = scmp.lt.s32.totalorder %s6963_s15, 3 }
   0x4   : > { %p166_p2 = pnand %p5614_p0, %p165_p1 }
   0x5   : > { %v246_v0 = vld [vmem:[%s7853_s1] sm:$0x3] (!%p166_p2)  ;;  %vm392_vm0 = vcmask (!%p166_p2), 1041408   ;;  %p195_p3 = scmp.lt.s32.totalorder (!%p166_p2), %s5610_s16, 1  ;;  %v5768_v2 = vld [vmem:[%s7853_s1 + $0x8] sm:$0x3] (!%p166_p2) }
   0x6   : > { %169 = sbr.rel (%p166_p2) target bundleno = 587 (0x24b), region = 32  ;;  %6763 = vmatprep.subr.msk.bf16.mxu1 (!%p166_p2), %vm392_vm0, %v246_v0  ;;  %v394_v1 = vsel (!%p166_p2), %vm392_vm0, %v246_v0, 0  ;;  %6767 = vmatprep.subr.msk.bf16.mxu0 (!%p166_p2), %vm392_vm0, %v5768_v2  ;;  %v7011_v3 = vsel (!%p166_p2), %vm392_vm0, %v5768_v2, 0  ;;  %v5806_v4 = vld [vmem:[%s7853_s1 + $0xa] sm:$0x3] (!%p166_p2)  ;;  %vm337_vm1 = vcmask (!%p166_p2), 31744  }
   0x7   : > { %6132 = vmatpush3.bf16.msra.mxu1 (!%p166_p2), %v394_v1  ;;  %v5654_v5 = vld [vmem:[%s7853_s1 + $0x2] sm:$0x3] (!%p166_p2)  ;;  %6284 = vmatpush3.bf16.msra.mxu0 (!%p166_p2), %v7011_v3  ;;  %vm2387_vm2 = vsmask.f32 (!%p166_p2), 6400  ;;  %v7032_v7 = vld [vmem:[%s7853_s1 + $0x4] sm:$0x3] (!%p166_p2) }
   0x8   : > { %6764 = vmatprep.subr.msk.bf16.mxu1 (!%p166_p2), %vm392_vm0, %v5654_v5  ;;  %6769 = vmatprep.subr.msk.bf16.mxu0 (!%p166_p2), %vm392_vm0, %v5806_v4  ;;  %v945_v9 = vsel (!%p166_p2), %vm392_vm0, %v5654_v5, 0  ;;  %v3125_v18 = vsel (!%p166_p2), %vm392_vm0, %v5806_v4, 0  ;;  %v7057_v40 = vld [vmem:[%s7853_s1 + $0xc] sm:$0x3] (!%p166_p2)  ;;  %vm3032_vm3 = vcmask (!%p166_p2), 1045504   ;;  %vm1364_vm5 = vcmask (!%p166_p2), 1046528  }
   0x9   : > { %vm741_vm4 = vsmask.f32 (!%p166_p2), 7424  ;;  %vm4055_vm6 = vsmask.f32 (!%p166_p2), 5376  ;;  %vm4700_vm7 = vcmask (!%p166_p2), 1044480  }
   0xd   : > { %s7858_s16 = smov (!%p195_p3, %s5610_s16), 1 }
   0xe   : > { %s6773_s25 = smul.u32 164, %s7858_s16  ;;  %s5617_s23 = sshll.u32 %s7858_s16, 1 }
   0xf   : > { %s208_s26 = scalar_lea.vmem %s7856_s4, %s5617_s23 }
  0x10   : > { %s7026_s28 = scalar_lea.vmem %s7852_s0, %s6773_s25 }
  0x11   : > { %v6786_v6 = vld [vmem:[%s7026_s28] sm:$0xff]   ;;  %v6787_v8 = vld [vmem:[%s7026_s28 + $0x8] sm:$0xff]   ;;  %v6789_v11 = vld [vmem:[%s7026_s28 + $0x10] sm:$0xff]  }
  0x12   : > { %6133 = vmatprep.mubr.msk.bf16.mxu1 %vm337_vm1, %v6786_v6  ;;  %v6788_v10 = vld [vmem:[%s7026_s28 + $0x8] sm:$0xfe]   ;;  %v6790_v12 = vld [vmem:[%s7026_s28 + $0x10] sm:$0xff]   ;;  %v2397_v15 = vshrl.u32 %v6789_v11, 16  ;;  %v2400_v16 = vshll.u32 %v6789_v11, 16  ;;  %v6791_v17 = vld [vmem:[%s7026_s28 + $0x18] sm:$0xff]  }
  0x13   : > { %6134 = vmatmul.mubr.msk.bf16.vlgmr.msra.gmra.mrb[0].mxu1 %vm337_vm1, %v6787_v8  ;;  %v2389_v13 = vshrl.u32 %v6788_v10, 16  ;;  %v2392_v14 = vshll.u32 %v6788_v10, 16  ;;  %v2406_v23 = vshrl.u32 %v6791_v17, 16  ;;  %v2409_v24 = vshll.u32 %v6791_v17, 16  ;;  %v6792_v25 = vld [vmem:[%s7026_s28 + $0x18] sm:$0xff]   ;;  %v6793_v26 = vld [vmem:[%s7026_s28 + $0x20] sm:$0xff]  }
  0x14   : > { %6170 = vmatpush3.bf16.msra.mxu1 %v945_v9  ;;  %6137 = vmatprep.mubr.msk.bf16.mxu1 %vm337_vm1, %v6790_v12  ;;  %v2399_v21 = vrot.slane %v2397_v15, 1  ;;  %v2402_v22 = vrot.slane %v2400_v16, 2  ;;  %v2415_v31 = vshrl.u32 %v6793_v26, 16  ;;  %v2418_v32 = vshll.u32 %v6793_v26, 16  ;;  %v6794_v33 = vld [vmem:[%s7026_s28 + $0x20] sm:$0xff]   ;;  %v6795_v34 = vld [vmem:[%s7026_s28 + $0x28] sm:$0xff]  }
  0x15   : > { %6765 = vmatprep.subr.msk.bf16.mxu1 %vm392_vm0, %v7032_v7  ;;  %v2391_v19 = vrot.slane %v2389_v13, 1  ;;  %v2394_v20 = vrot.slane %v2392_v14, 2  ;;  %v2408_v29 = vrot.slane %v2406_v23, 1  ;;  %v2411_v30 = vrot.slane %v2409_v24, 2  ;;  %v6796_v42 = vld [vmem:[%s7026_s28 + $0x28] sm:$0xff]   ;;  %v6797_v43 = vld [vmem:[%s7026_s28 + $0x30] sm:$0xff]  }
  0x16   : > { %v2403_v28 = vor.u32 %v2402_v22, %v2399_v21  ;;  %v2417_v37 = vrot.slane %v2415_v31, 1  ;;  %v2420_v38 = vrot.slane %v2418_v32, 2  ;;  %v2424_v39 = vshrl.u32 %v6795_v34, 16  ;;  %v6798_v47 = vld [vmem:[%s7026_s28 + $0x30] sm:$0xff]   ;;  %v6799_v51 = vld [vmem:[%s7026_s28 + $0x38] sm:$0xff]   ;;  %v6801_v58 = vld [vmem:[%s7026_s28 + $0x40] sm:$0xff]  }
  0x17   : > { %v2395_v27 = vor.u32 %v2394_v20, %v2391_v19  ;;  %v2412_v36 = vor.u32 %v2411_v30, %v2408_v29  ;;  %v2427_v41 = vshll.u32 %v6795_v34, 16  ;;  %v2433_v49 = vshrl.u32 %v6797_v43, 16  ;;  %v6803_v1 = vld [vmem:[%s7026_s28 + $0x48] sm:$0xff]   ;;  %v6800_v4 = vld [vmem:[%s7026_s28 + $0x38] sm:$0xff]   ;;  %v6805_v8 = vld [vmem:[%s7026_s28 + $0x50] sm:$0xff]  }
  0x18   : > { %v2421_v45 = vor.u32 %v2420_v38, %v2417_v37  ;;  %v2426_v46 = vrot.slane %v2424_v39, 1  ;;  %v2436_v50 = vshll.u32 %v6797_v43, 16  ;;  %v2442_v56 = vshrl.u32 %v6799_v51, 16  ;;  %v6802_v12 = vld [vmem:[%s7026_s28 + $0x40] sm:$0xff]   ;;  %v6804_v23 = vld [vmem:[%s7026_s28 + $0x48] sm:$0xff]   ;;  %v6806_v24 = vld [vmem:[%s7026_s28 + $0x50] sm:$0xff]  }
  0x19   : > { %v2404_v35 = vsel %vm2387_vm2, %v2395_v27, %v2403_v28  ;;  %v2413_v44 = vsel %vm2387_vm2, %v2403_v28, %v2412_v36  ;;  %v2429_v48 = vrot.slane %v2427_v41, 2  ;;  %v2435_v54 = vrot.slane %v2433_v49, 1  ;;  %v6810_v29 = vld [vmem:[%s7026_s28 + $0x10] sm:$0xff]   ;;  %v6809_v34 = vld [vmem:[%s7026_s28 + $0x8] sm:$0xfc]   ;;  %v6811_v37 = vld [vmem:[%s7026_s28 + $0x60] sm:$0xff]  }
  0x1a   : > { %6285 = vmatprep.mubr.msk.bf16.mxu0 %vm337_vm1, %v2404_v35  ;;  %v2422_v52 = vsel %vm2387_vm2, %v2412_v36, %v2421_v45  ;;  %v2438_v55 = vrot.slane %v2436_v50, 2  ;;  %v2445_v57 = vshll.u32 %v6799_v51, 16  ;;  %v2444_v60 = vrot.slane %v2442_v56, 1  ;;  %v6808_v35 = vld [vmem:[%s7026_s28 + $0x58] sm:$0xff]   ;;  %v6823_v49 = vld [vmem:[%s7026_s28] sm:$0xff]   ;;  %v6816_v50 = vld [vmem:[%s7026_s28 + $0x28] sm:$0xff]  }
  0x1b   : > { %6138 = vmatmul.mubr.msk.bf16.gmra.mrb[4].mxu1 %vm337_vm1, %v6792_v25  ;;  %6286 = vmatmul.mubr.msk.bf16.vlgmr.msra.gmra.mrb[0].mxu0 %vm337_vm1, %v2413_v44  ;;  %v2430_v53 = vor.u32 %v2429_v48, %v2426_v46  ;;  %v2451_v63 = vshrl.u32 %v6801_v58, 16  ;;  %v2454_v0 = vshll.u32 %v6801_v58, 16  ;;  %v2460_v9 = vshrl.u32 %v6803_v1, 16  ;;  %v6814_v44 = vld [vmem:[%s7026_s28 + $0x20] sm:$0xff]  }
  0x1c   : > { %6141 = vmatprep.mubr.msk.bf16.mxu1 %vm337_vm1, %v6794_v33  ;;  %6322 = vmatpush3.bf16.msra.mxu0 %v3125_v18  ;;  %v2439_v59 = vor.u32 %v2438_v55, %v2435_v54  ;;  %v2447_v62 = vrot.slane %v2445_v57, 2  ;;  %v2463_v10 = vshll.u32 %v6803_v1, 16  ;;  %v2469_v14 = vshrl.u32 %v6805_v8, 16  ;;  %v6807_v18 = vld [vmem:[%s7026_s28 + $0x58] sm:$0xff]   ;;  %v6818_v55 = vld [vmem:[%s7026_s28 + $0x30] sm:$0xff]  }
  0x1d   : > { %6289 = vmatprep.mubr.msk.bf16.mxu0 %vm337_vm1, %v2422_v52  ;;  %6770 = vmatprep.subr.msk.bf16.mxu0 %vm392_vm0, %v7057_v40  ;;  %v2431_v61 = vsel %vm2387_vm2, %v2421_v45, %v2430_v53  ;;  %v2453_v5 = vrot.slane %v2451_v63, 1  ;;  %v2456_v6 = vrot.slane %v2454_v0, 2  ;;  %v2472_v15 = vshll.u32 %v6805_v8, 16  ;;  %v6813_v45 = vld [vmem:[%s7026_s28 + $0x68] sm:$0xff]   ;;  %v6820_v0 = vld [vmem:[%s7026_s28 + $0x38] sm:$0xff]   ;;  %v6826_v1 = vld [vmem:[%s7026_s28 + $0x10] sm:$0xff]  }
  0x1e   : > { %v2440_v2 = vsel %vm2387_vm2, %v2430_v53, %v2439_v59  ;;  %v2448_v11 = vor.u32 %v2447_v62, %v2444_v60  ;;  %v2462_v16 = vrot.slane %v2460_v9, 1  ;;  %v2465_v17 = vrot.slane %v2463_v10, 2  ;;  %v6824_v53 = vld [vmem:[%s7026_s28 + $0x8] sm:$0xff]  }
  0x1f   : > { %v2457_v13 = vor.u32 %v2456_v6, %v2453_v5  ;;  %v2471_v21 = vrot.slane %v2469_v14, 1  ;;  %v2474_v22 = vrot.slane %v2472_v15, 2  ;;  %v2478_v26 = vshrl.u32 %v6807_v18, 16  ;;  %v7125_v57 = vld [vmem:[%s7853_s1 + $0xe] sm:$0x3]  ;;  %v6828_v6 = vld [vmem:[%s7026_s28 + $0x18] sm:$0xff]  }
  0x20   : > { %v2449_v19 = vsel %vm2387_vm2, %v2439_v59, %v2448_v11  ;;  %v2466_v25 = vor.u32 %v2465_v17, %v2462_v16  ;;  %v2481_v27 = vshll.u32 %v6807_v18, 16  ;;  %v3033_v38 = vrot.slane %v6809_v34, 2  ;;  %v6817_v59 = vld [vmem:[%s7026_s28 + $0x78] sm:$0xff]   ;;  %v6821_v10 = vld [vmem:[%s7026_s28 + $0x88] sm:$0xff]  }
  0x21   : > { %v2458_v20 = vsel %vm2387_vm2, %v2448_v11, %v2457_v13  ;;  %v2475_v28 = vor.u32 %v2474_v22, %v2471_v21  ;;  %v2480_v31 = vrot.slane %v2478_v26, 1  ;;  %v3034_v39 = vrot.slane %v6810_v29, 2  ;;  %v6825_v18 = vld [vmem:[%s7026_s28 + $0x48] sm:$0xff]  }
  0x22   : > { %v2467_v30 = vsel %vm2387_vm2, %v2457_v13, %v2466_v25  ;;  %v2483_v32 = vrot.slane %v2481_v27, 2  ;;  %v3038_v48 = vrot.slane %v6814_v44, 2  ;;  %v3636_v52 = vsel %vm392_vm0, %v7057_v40, 0  ;;  %v6819_v40 = vld [vmem:[%s7026_s28 + $0x80] sm:$0xff]   ;;  %v6832_v27 = vld [vmem:[%s7026_s28 + $0x28] sm:$0xff]   ;;  %v6836_v44 = vld [vmem:[%s7026_s28 + $0x38] sm:$0xff]  }
  0x23   : > { %6142 = vmatmul.mubr.msk.bf16.gmra.mrb[8].mxu1 %vm337_vm1, %v6796_v42  ;;  %6290 = vmatmul.mubr.msk.bf16.gmra.mrb[4].mxu0 %vm337_vm1, %v2431_v61  ;;  %v2476_v33 = vsel %vm2387_vm2, %v2466_v25, %v2475_v28  ;;  %v6812_v42 = vld [vmem:[%s7026_s28 + $0x18] sm:$0xff]   ;;  %v3035_v43 = vsel %vm3032_vm3, %v3033_v38, %v3034_v39  ;;  %v745_v56 = vshll.u32 %v6823_v49, 16  ;;  %v3040_v58 = vrot.slane %v6816_v50, 2 }
  0x24   : > { %6145 = vmatprep.mubr.msk.bf16.mxu1 %vm337_vm1, %v6798_v47  ;;  %6293 = vmatprep.mubr.msk.bf16.mxu0 %vm337_vm1, %v2440_v2  ;;  %v7098_v36 = vor.u32 %v2483_v32, %v2480_v31  ;;  %v3036_v46 = vrot.slane %v6812_v42, 2  ;;  %v6815_v47 = vld [vmem:[%s7026_s28 + $0x70] sm:$0xff]   ;;  %v750_v60 = vshll.u32 %v6824_v53, 16  ;;  %v3042_v61 = vrot.slane %v6818_v55, 2  ;;  %v6829_v38 = vld [vmem:[%s7026_s28 + $0x58] sm:$0xff]  }
  0x25   : > { %v743_v62 = vshrl.u32 %v6823_v49, 16  ;;  %v747_v63 = vrot.slane %v745_v56, 1  ;;  %v3041_v2 = vsel %vm3032_vm3, %v3038_v48, %v3040_v58  ;;  %v758_v11 = vshll.u32 %v6826_v1, 16  ;;  %v6833_v56 = vld [vmem:[%s7026_s28 + $0x68] sm:$0xff]  }
  0x26   : > { %v2485_v41 = vsel %vm2387_vm2, %v2475_v28, %v7098_v36  ;;  %v3037_v51 = vsel %vm3032_vm3, %v3034_v39, %v3036_v46  ;;  %v3039_v54 = vsel %vm3032_vm3, %v3036_v46, %v3038_v48  ;;  %v752_v5 = vrot.slane %v750_v60, 1 }
  0x27   : > { %v3043_v8 = vsel %vm3032_vm3, %v3040_v58, %v3042_v61  ;;  %v748_v9 = vor.u32 %v747_v63, %v743_v62  ;;  %v754_v13 = vshrl.u32 %v6824_v53, 16  ;;  %v762_v16 = vshrl.u32 %v6826_v1, 16  ;;  %v6840_v1 = vld [vmem:[%s7026_s28 + $0x48] sm:$0xff]  }
  0x28   : > { %v766_v17 = vshll.u32 %v6828_v6, 16  ;;  %v1457_v28 = vsel %vm392_vm0, %v7032_v7, 0  ;;  %v3048_v29 = vrot.slane %v6825_v18, 2  ;;  %v6831_v7 = vld [vmem:[%s7026_s28 + $0x60] sm:$0xff]   ;;  %v3052_v48 = vrot.slane %v6829_v38, 2 }
  0x29   : > { %v753_v15 = vsel %vm741_vm4, %v748_v9, %v752_v5  ;;  %v756_v22 = vor.u32 %v754_v13, %v752_v5  ;;  %v3054_v49 = vrot.slane %v6831_v7, 2 }
  0x2a   : > { %v768_v26 = vrot.slane %v766_v17, 1  ;;  %v6839_v17 = vld [vmem:[%s7026_s28 + $0x80] sm:$0xff]  }
  0x2b   : > { %6146 = vmatmul.mubr.msk.bf16.gmra.mrb[12].mxu1 %vm337_vm1, %v6800_v4  ;;  %6294 = vmatmul.mubr.msk.bf16.gmra.mrb[8].mxu0 %vm337_vm1, %v2449_v19  ;;  %v6822_v4 = vld [vmem:[%s7026_s28 + $0x40] sm:$0xff]   ;;  %v760_v19 = vrot.slane %v758_v11, 1  ;;  %v3055_v62 = vsel %vm3032_vm3, %v3052_v48, %v3054_v49  ;;  %v814_v11 = vshll.u32 %v6840_v1, 16 }
  0x2c   : > { %6149 = vmatprep.mubr.msk.bf16.mxu1 %vm337_vm1, %v6802_v12  ;;  %6297 = vmatprep.mubr.msk.bf16.mxu0 %vm337_vm1, %v2458_v20  ;;  %v3044_v12 = vrot.slane %v6820_v0, 2  ;;  %v3046_v14 = vrot.slane %v6822_v4, 2  ;;  %v6830_v20 = vld [vmem:[%s7026_s28 + $0x20] sm:$0xff]  }
  0x2d   : > { %v764_v25 = vor.u32 %v762_v16, %v760_v19  ;;  %v761_v31 = vsel %vm741_vm4, %v756_v22, %v760_v19  ;;  %v7194_v22 = vld [vmem:[%s7853_s1 + $0x6] sm:$0x3] }
  0x2e   : > { %v3045_v21 = vsel %vm3032_vm3, %v3042_v61, %v3044_v12  ;;  %v3049_v42 = vsel %vm3032_vm3, %v3046_v14, %v3048_v29  ;;  %v6835_v61 = vld [vmem:[%s7026_s28 + $0x70] sm:$0xff]  }
  0x2f   : > { %v769_v34 = vsel %vm741_vm4, %v764_v25, %v768_v26 }
  0x33   : > { %6150 = vmatmul.mubr.msk.bf16.gmra.mrb[16].mxu1 %vm337_vm1, %v6804_v23  ;;  %6298 = vmatmul.mubr.msk.bf16.gmra.mrb[12].mxu0 %vm337_vm1, %v2467_v30  ;;  %v6827_v23 = vld [vmem:[%s7026_s28 + $0x50] sm:$0xff]   ;;  %v774_v30 = vshll.u32 %v6830_v20, 16 }
  0x34   : > { %6153 = vmatprep.mubr.msk.bf16.mxu1 %vm337_vm1, %v6806_v24  ;;  %6301 = vmatprep.mubr.msk.bf16.mxu0 %vm337_vm1, %v2476_v33  ;;  %v3047_v24 = vsel %vm3032_vm3, %v3044_v12, %v3046_v14  ;;  %v3050_v32 = vrot.slane %v6827_v23, 2  ;;  %v770_v33 = vshrl.u32 %v6828_v6, 16  ;;  %v3058_v6 = vrot.slane %v6835_v61, 2  ;;  %v6837_v12 = vld [vmem:[%s7026_s28 + $0x78] sm:$0xff]   ;;  %v6842_v14 = vld [vmem:[%s7026_s28 + $0x50] sm:$0xff]  }
  0x35   : > { %v776_v39 = vrot.slane %v774_v30, 1  ;;  %v822_v23 = vshll.u32 %v6842_v14, 16 }
  0x3b   : > { %6154 = vmatmul.mubr.msk.bf16.gmra.mrb[20].mxu1 %vm337_vm1, %v6808_v35  ;;  %6302 = vmatmul.mubr.msk.bf16.gmra.mrb[16].mxu0 %vm337_vm1, %v2485_v41  ;;  %v778_v35 = vshrl.u32 %v6830_v20, 16  ;;  %v6834_v41 = vld [vmem:[%s7026_s28 + $0x30] sm:$0xff]   ;;  %v816_v20 = vrot.slane %v814_v11, 1  ;;  %v6850_v11 = vld [vmem:[%s7026_s28 + $0x20] sm:$0xff]  }
  0x3c   : > { %6157 = vmatprep.mubr.msk.bf16.mxu1 %vm337_vm1, %v6811_v37  ;;  %6323 = vmatprep.mubr.msk.bf16.mxu0 %vm337_vm1, %v3035_v43  ;;  %v782_v37 = vshll.u32 %v6832_v27, 16  ;;  %v772_v43 = vor.u32 %v770_v33, %v768_v26  ;;  %v790_v50 = vshll.u32 %v6834_v41, 16  ;;  %v794_v53 = vshrl.u32 %v6834_v41, 16  ;;  %v6846_v33 = vld [vmem:[%s7026_s28 + $0x60] sm:$0xff]   ;;  %v6849_v41 = vld [vmem:[%s7026_s28 + $0x68] sm:$0xff]  }
  0x3d   : > { %v780_v46 = vor.u32 %v778_v35, %v776_v39  ;;  %v3062_v26 = vrot.slane %v6839_v17, 2  ;;  %v6857_v17 = vld [vmem:[%s7026_s28 + $0x88] sm:$0xff]  }
  0x3e   : > { %v792_v58 = vrot.slane %v790_v50, 1  ;;  %v846_v50 = vshll.u32 %v6849_v41, 16 }
  0x40   : > { %v796_v63 = vor.u32 %v794_v53, %v792_v58 }
  0x43   : > { %6158 = vmatmul.mubr.msk.bf16.gmra.mrb[24].mxu1 %vm337_vm1, %v6813_v45  ;;  %6324 = vmatmul.mubr.msk.bf16.vlgmr.msra.gmra.mrb[0].mxu0 %vm337_vm1, %v3037_v51  ;;  %v3051_v45 = vsel %vm3032_vm3, %v3048_v29, %v3050_v32  ;;  %v777_v51 = vsel %vm741_vm4, %v772_v43, %v776_v39  ;;  %v826_v29 = vshrl.u32 %v6842_v14, 16  ;;  %v838_v43 = vshll.u32 %v6846_v33, 16 }
  0x44   : > { %6161 = vmatprep.mubr.msk.bf16.mxu1 %vm337_vm1, %v6815_v47  ;;  %6360 = vmatpush3.bf16.msra.mxu0 %v3636_v52  ;;  %v784_v47 = vrot.slane %v782_v37, 1  ;;  %v786_v52 = vshrl.u32 %v6832_v27, 16  ;;  %v818_v27 = vshrl.u32 %v6840_v1, 16  ;;  %v6843_v37 = vld [vmem:[%s7026_s28 + $0x90] sm:$0xff]   ;;  %v850_v1 = vshrl.u32 %v6849_v41, 16 }
  0x45   : > { %6327 = vmatprep.mubr.msk.bf16.mxu0 %vm337_vm1, %v3039_v54  ;;  %6771 = vmatprep.subr.msk.bf16.mxu0 %vm392_vm0, %v7125_v57  ;;  %v798_v54 = vshll.u32 %v6836_v44, 16 }
  0x46   : > { %v785_v55 = vsel %vm741_vm4, %v780_v46, %v784_v47  ;;  %v788_v60 = vor.u32 %v786_v52, %v784_v47  ;;  %v820_v35 = vor.u32 %v818_v27, %v816_v20  ;;  %v6851_v52 = vld [vmem:[%s7026_s28 + $0x70] sm:$0xff]  }
  0x47   : > { %v800_v0 = vrot.slane %v798_v54, 1  ;;  %v6854_v27 = vld [vmem:[%s7026_s28 + $0x30] sm:$0xff]  }
  0x48   : > { %v793_v5 = vsel %vm741_vm4, %v788_v60, %v792_v58  ;;  %v6847_v58 = vld [vmem:[%s7026_s28 + $0x10] sm:$0xfc]   ;;  %v6853_v60 = vld [vmem:[%s7026_s28 + $0x78] sm:$0xff]  }
  0x49   : > { %v801_v9 = vsel %vm741_vm4, %v796_v63, %v800_v0 }
  0x4b   : > { %6162 = vmatmul.mubr.msk.bf16.gmra.mrb[28].mxu1 %vm337_vm1, %v6817_v59  ;;  %6328 = vmatmul.mubr.msk.bf16.gmra.mrb[4].mxu0 %vm337_vm1, %v3041_v2  ;;  %v6838_v59 = vld [vmem:[%s7026_s28 + $0x40] sm:$0xff]   ;;  %v3056_v2 = vrot.slane %v6833_v56, 2 }
  0x4c   : > { %6165 = vmatprep.mubr.msk.bf16.mxu1 %vm337_vm1, %v6819_v40  ;;  %6331 = vmatprep.mubr.msk.bf16.mxu0 %vm337_vm1, %v3043_v8  ;;  %v3053_v40 = vsel %vm3032_vm3, %v3050_v32, %v3052_v48  ;;  %v806_v4 = vshll.u32 %v6838_v59, 16  ;;  %v802_v8 = vshrl.u32 %v6836_v44, 16  ;;  %v824_v32 = vrot.slane %v822_v23, 1  ;;  %v6845_v48 = vld [vmem:[%s7026_s28 + $0x98] ss:$0 sps:$4 sm:$0x33]  }
  0x4d   : > { %v3059_v18 = vsel %vm3032_vm3, %v3056_v2, %v3058_v6  ;;  %v3068_v61 = vrot.slane %v6845_v48, 2  ;;  %v866_v23 = vshrl.u32 %v6853_v60, 16 }
  0x4e   : > { %v808_v13 = vrot.slane %v806_v4, 1  ;;  %v804_v16 = vor.u32 %v802_v8, %v800_v0  ;;  %v828_v39 = vor.u32 %v826_v29, %v824_v32  ;;  %v825_v44 = vsel %vm741_vm4, %v820_v35, %v824_v32  ;;  %v6855_v8 = vld [vmem:[%s7026_s28 + $0x80] sm:$0xff]   ;;  %v6859_v29 = vld [vmem:[%s7026_s28 + $0x90] ss:$0 sps:$4 sm:$0x11]   ;;  %v6856_v32 = vld [vmem:[%s7026_s28 + $0x38] sm:$0xff]  }
  0x4f   : > { %v3553_v41 = vrot.slane %v6856_v32, 2  ;;  %v6876_v32 = vld [vmem:[%s7026_s28 + $0x40] sm:$0xff]  }
  0x50   : > { %v809_v25 = vsel %vm741_vm4, %v804_v16, %v808_v13 }
  0x53   : > { %6166 = vmatmul.mubr.msk.bf16.gmra.mrb[32].mxu1 %vm337_vm1, %v6821_v10  ;;  %6332 = vmatmul.mubr.msk.bf16.gmra.mrb[8].mxu0 %vm337_vm1, %v3045_v21  ;;  %v810_v10 = vshrl.u32 %v6838_v59, 16  ;;  %v6844_v21 = vld [vmem:[%s7026_s28 + $0x58] sm:$0xff]  }
  0x54   : > { %6171 = vmatprep.mubr.msk.bf16.mxu1 %vm337_vm1, %v753_v15  ;;  %6335 = vmatprep.mubr.msk.bf16.mxu0 %vm337_vm1, %v3047_v24  ;;  %v3057_v15 = vsel %vm3032_vm3, %v3054_v49, %v3056_v2  ;;  %v3060_v24 = vrot.slane %v6837_v12, 2  ;;  %v830_v30 = vshll.u32 %v6844_v21, 16  ;;  %v834_v46 = vshrl.u32 %v6844_v21, 16 }
  0x55   : > { %v812_v19 = vor.u32 %v810_v10, %v808_v13  ;;  %v842_v49 = vshrl.u32 %v6846_v33, 16  ;;  %v3544_v2 = vrot.slane %v6847_v58, 2  ;;  %v6852_v13 = vld [vmem:[%s7026_s28 + $0x28] sm:$0xff]   ;;  %v4281_v33 = vsel %vm392_vm0, %v7125_v57, 0 }
  0x56   : > { %v3063_v38 = vsel %vm3032_vm3, %v3060_v24, %v3062_v26  ;;  %v832_v7 = vrot.slane %v830_v30, 1  ;;  %v3549_v21 = vrot.slane %v6852_v13, 2 }
  0x58   : > { %v833_v47 = vsel %vm741_vm4, %v828_v39, %v832_v7  ;;  %v836_v54 = vor.u32 %v834_v46, %v832_v7  ;;  %v886_v39 = vshll.u32 %v6859_v29, 16  ;;  %v3551_v7 = vrot.slane %v6854_v27, 2  ;;  %v6858_v46 = vld [vmem:[%s7026_s28 + $0x40] sm:$0xff]  }
  0x5a   : > { %v3552_v48 = vsel %vm3032_vm3, %v3549_v21, %v3551_v7 }
  0x5b   : > { %6172 = vmatmul.mubr.msk.bf16.vlgmr.msra.gmra.mrb[0].mxu1 %vm337_vm1, %v761_v31  ;;  %6336 = vmatmul.mubr.msk.bf16.gmra.mrb[12].mxu0 %vm337_vm1, %v3049_v42  ;;  %v6841_v31 = vld [vmem:[%s7026_s28 + $0x88] sm:$0xff]  }
  0x5c   : > { %6175 = vmatprep.mubr.msk.bf16.mxu1 %vm337_vm1, %v769_v34  ;;  %6208 = vmatpush3.bf16.msra.mxu1 %v1457_v28  ;;  %v817_v28 = vsel %vm741_vm4, %v812_v19, %v816_v20  ;;  %v3061_v34 = vsel %vm3032_vm3, %v3058_v6, %v3060_v24  ;;  %v3064_v42 = vrot.slane %v6841_v31, 2  ;;  %v862_v6 = vshll.u32 %v6853_v60, 16  ;;  %v6863_v60 = vld [vmem:[%s7026_s28 + $0x50] sm:$0xff]  }
  0x5d   : > { %6339 = vmatprep.mubr.msk.bf16.mxu0 %vm337_vm1, %v3051_v45  ;;  %6766 = vmatprep.subr.msk.bf16.mxu1 %vm392_vm0, %v7194_v22  ;;  %v3066_v45 = vrot.slane %v6843_v37, 2  ;;  %v3547_v19 = vrot.slane %v6850_v11, 2 }
  0x5e   : > { %v3065_v53 = vsel %vm3032_vm3, %v3062_v26, %v3064_v42  ;;  %v864_v16 = vrot.slane %v862_v6, 1  ;;  %v878_v26 = vshll.u32 %v6857_v17, 16  ;;  %v6868_v6 = vld [vmem:[%s7026_s28 + $0x20] sm:$0xff]  }
  0x5f   : > { %v3067_v56 = vsel %vm3032_vm3, %v3064_v42, %v3066_v45  ;;  %v3069_v10 = vsel %vm3032_vm3, %v3066_v45, %v3068_v61  ;;  %v882_v42 = vshrl.u32 %v6857_v17, 16  ;;  %v6861_v45 = vld [vmem:[%s7026_s28] sm:$0xfe]   ;;  %v1372_v13 = vrot.slane %v6868_v6, 1 }
  0x60   : > { %v868_v31 = vor.u32 %v866_v23, %v864_v16  ;;  %v880_v37 = vrot.slane %v878_v26, 1  ;;  %v6874_v23 = vld [vmem:[%s7026_s28 + $0x38] sm:$0xff]  }
  0x61   : > { %v1378_v29 = vrot.slane %v6874_v23, 1  ;;  %v5158_v23 = vld [vmem:[%s7854_s2 + $0x30] sm:$0xff] }
  0x63   : > { %6176 = vmatmul.mubr.msk.bf16.gmra.mrb[4].mxu1 %vm337_vm1, %v777_v51  ;;  %6340 = vmatmul.mubr.msk.bf16.gmra.mrb[16].mxu0 %vm337_vm1, %v3053_v40  ;;  %v840_v51 = vrot.slane %v838_v43, 1  ;;  %v848_v40 = vrot.slane %v846_v50, 1  ;;  %v6862_v43 = vld [vmem:[%s7026_s28 + $0x8] sm:$0xff]   ;;  %v3554_v50 = vsel %vm3032_vm3, %v3551_v7, %v3553_v41  ;;  %v1380_v7 = vrot.slane %v6876_v32, 1 }
  0x64   : > { %6179 = vmatprep.mubr.msk.bf16.mxu1 %vm337_vm1, %v785_v55  ;;  %6343 = vmatprep.mubr.msk.bf16.mxu0 %vm337_vm1, %v3055_v62  ;;  %v6848_v55 = vld [vmem:[%s7026_s28 + $0x18] sm:$0xff]   ;;  %v854_v62 = vshll.u32 %v6851_v52, 16 }
  0x65   : > { %v844_v59 = vor.u32 %v842_v49, %v840_v51  ;;  %v841_v63 = vsel %vm741_vm4, %v836_v54, %v840_v51  ;;  %v3545_v0 = vrot.slane %v6848_v55, 2  ;;  %v852_v12 = vor.u32 %v850_v1, %v848_v40  ;;  %v6860_v51 = vld [vmem:[%s7026_s28 + $0x48] sm:$0xff]  }
  0x66   : > { %v884_v49 = vor.u32 %v882_v42, %v880_v37  ;;  %v3555_v54 = vrot.slane %v6858_v46, 2  ;;  %v3557_v58 = vrot.slane %v6860_v51, 2  ;;  %v6880_v46 = vld [vmem:[%s7026_s28 + $0x50] sm:$0xff]   ;;  %v6886_v51 = vld [vmem:[%s7026_s28 + $0x18] sm:$0xff]  }
  0x67   : > { %v849_v4 = vsel %vm741_vm4, %v844_v59, %v848_v40  ;;  %v3546_v14 = vsel %vm3032_vm3, %v3544_v2, %v3545_v0  ;;  %v3548_v30 = vsel %vm3032_vm3, %v3545_v0, %v3547_v19  ;;  %v6866_v40 = vld [vmem:[%s7026_s28 + $0x18] sm:$0xff]   ;;  %v3559_v2 = vrot.slane %v6863_v60, 2  ;;  %v5154_v60 = vld [vmem:[%s7854_s2 + $0x10] sm:$0xff] }
  0x68   : > { %v3556_v61 = vsel %vm3032_vm3, %v3553_v41, %v3555_v54  ;;  %v3558_v0 = vsel %vm3032_vm3, %v3555_v54, %v3557_v58  ;;  %v1370_v1 = vrot.slane %v6866_v40, 1  ;;  %v6877_v41 = vld [vmem:[%s7026_s28 + $0x88] sm:$0xff]   ;;  %v6885_v54 = vld [vmem:[%s7026_s28 + $0x10] sm:$0xfc]   ;;  %v6884_v40 = vld [vmem:[%s7026_s28 + $0x60] sm:$0xff]  }
  0x69   : > { %v3560_v11 = vsel %vm3032_vm3, %v3557_v58, %v3559_v2  ;;  %v7338_v58 = vld [vmem:[%s7026_s28 + $0x98] sm:$0xff]  }
  0x6b   : > { %6180 = vmatmul.mubr.msk.bf16.gmra.mrb[8].mxu1 %vm337_vm1, %v793_v5  ;;  %6344 = vmatmul.mubr.msk.bf16.gmra.mrb[20].mxu0 %vm337_vm1, %v3057_v15  ;;  %v858_v5 = vshrl.u32 %v6851_v52, 16  ;;  %v1365_v52 = vrot.slane %v6861_v45, 1  ;;  %v1381_v45 = vsel %vm1364_vm5, %v1378_v29, %v1380_v7 }
  0x6c   : > { %6183 = vmatprep.mubr.msk.bf16.mxu1 %vm337_vm1, %v801_v9  ;;  %6347 = vmatprep.mubr.msk.bf16.mxu0 %vm337_vm1, %v3059_v18  ;;  %v856_v9 = vrot.slane %v854_v62, 1  ;;  %v870_v18 = vshll.u32 %v6855_v8, 16 }
  0x6e   : > { %v860_v15 = vor.u32 %v858_v5, %v856_v9  ;;  %v857_v20 = vsel %vm741_vm4, %v852_v12, %v856_v9  ;;  %v6870_v9 = vld [vmem:[%s7026_s28 + $0x28] sm:$0xff]   ;;  %v6867_v12 = vld [vmem:[%s7026_s28 + $0x60] sm:$0xff]  }
  0x6f   : > { %v3563_v17 = vrot.slane %v6867_v12, 2  ;;  %v5156_v12 = vld [vmem:[%s7854_s2 + $0x20] sm:$0xff] }
  0x70   : > { %v865_v24 = vsel %vm741_vm4, %v860_v15, %v864_v16  ;;  %v6869_v15 = vld [vmem:[%s7026_s28 + $0x68] sm:$0xff]   ;;  %v1374_v16 = vrot.slane %v6870_v9, 1  ;;  %v4060_v9 = vshll.u32 %v6885_v54, 16 }
  0x73   : > { %6184 = vmatmul.mubr.msk.bf16.gmra.mrb[12].mxu1 %vm337_vm1, %v809_v25  ;;  %6348 = vmatmul.mubr.msk.bf16.gmra.mrb[24].mxu0 %vm337_vm1, %v3061_v34  ;;  %v874_v25 = vshrl.u32 %v6855_v8, 16  ;;  %v3550_v34 = vsel %vm3032_vm3, %v3547_v19, %v3549_v21  ;;  %v6872_v19 = vld [vmem:[%s7026_s28 + $0x30] sm:$0xff]   ;;  %v1375_v21 = vsel %vm1364_vm5, %v1372_v13, %v1374_v16 }
  0x74   : > { %6187 = vmatprep.mubr.msk.bf16.mxu1 %vm337_vm1, %v817_v28  ;;  %6351 = vmatprep.mubr.msk.bf16.mxu0 %vm337_vm1, %v3063_v38  ;;  %v872_v28 = vrot.slane %v870_v18, 1  ;;  %v7251_v38 = vld [vmem:[%s7853_s1 + $0x10] sm:$0x3]  ;;  %v1373_v18 = vsel %vm1364_vm5, %v1370_v1, %v1372_v13  ;;  %v1376_v26 = vrot.slane %v6872_v19, 1 }
  0x76   : > { %v876_v35 = vor.u32 %v874_v25, %v872_v28  ;;  %v873_v57 = vsel %vm741_vm4, %v868_v31, %v872_v28  ;;  %v6871_v25 = vld [vmem:[%s7026_s28 + $0x70] sm:$0xff]   ;;  %v6873_v28 = vld [vmem:[%s7026_s28 + $0x78] sm:$0xff]   ;;  %v1377_v31 = vsel %vm1364_vm5, %v1374_v16, %v1376_v26  ;;  %v5157_v16 = vld [vmem:[%s7854_s2 + $0x28] sm:$0xff] }
  0x7b   : > { %6188 = vmatmul.mubr.msk.bf16.gmra.mrb[16].mxu1 %vm337_vm1, %v825_v44  ;;  %6352 = vmatmul.mubr.msk.bf16.gmra.mrb[28].mxu0 %vm337_vm1, %v3065_v53  ;;  %v881_v44 = vsel %vm741_vm4, %v876_v35, %v880_v37  ;;  %v1366_v53 = vrot.slane %v6862_v43, 1  ;;  %v6878_v35 = vld [vmem:[%s7026_s28 + $0x48] sm:$0xff]   ;;  %v6875_v37 = vld [vmem:[%s7026_s28 + $0x80] sm:$0xff]   ;;  %v6965_v43 = vmov 0  }
  0x7c   : > { %6191 = vmatprep.mubr.msk.bf16.mxu1 %vm337_vm1, %v833_v47  ;;  %6355 = vmatprep.mubr.msk.bf16.mxu0 %vm337_vm1, %v3067_v56  ;;  %v888_v47 = vrot.slane %v886_v39, 1  ;;  %v6864_v56 = vld [vmem:[%s7026_s28 + $0x10] sm:$0xff]   ;;  %v1382_v42 = vrot.slane %v6878_v35, 1  ;;  %v6891_v35 = vld [vmem:[%s7026_s28 + $0x78] sm:$0xff]  }
  0x7d   : > { %v1367_v59 = vsel %vm1364_vm5, %v1365_v52, %v1366_v53  ;;  %v1368_v62 = vrot.slane %v6864_v56, 1  ;;  %6784 = vset.pattern.permute.xlu0 %v6965_v43  ;;  %6785 = vset.pattern.permute.xlu1 %v6965_v43 }
  0x7e   : > { %v889_v55 = vsel %vm741_vm4, %v884_v49, %v888_v47  ;;  %v3573_v47 = vrot.slane %v6877_v41, 2  ;;  %v6882_v49 = vld [vmem:[%s7026_s28 + $0x58] sm:$0xff]   ;;  %5200 = vperm.xlu1 %6785, %v5154_v60   ;;  %v5161_v41 = vld [vmem:[%s7854_s2 + $0x48] sm:$0xff] }
  0x7f   : > { %v1371_v8 = vsel %vm1364_vm5, %v1368_v62, %v1370_v1  ;;  %v6895_v60 = vld [vmem:[%s7026_s28 + $0x88] sm:$0xff]  }
  0x83   : > { %6192 = vmatmul.mubr.msk.bf16.gmra.mrb[20].mxu1 %vm337_vm1, %v841_v63  ;;  %6356 = vmatmul.mubr.msk.bf16.gmra.mrb[32].mxu0 %vm337_vm1, %v3069_v10  ;;  %v6865_v63 = vld [vmem:[%s7026_s28 + $0x58] sm:$0xff]   ;;  %v1968_v10 = vsel %vm392_vm0, %v7194_v22, 0  ;;  %v6956_v22 = vld [vmem:[%s7853_s1 + $0x8] sm:$0x3] }
  0x84   : > { %6195 = vmatprep.mubr.msk.bf16.mxu1 %vm337_vm1, %v849_v4  ;;  %6361 = vmatprep.mubr.msk.bf16.mxu0 %vm337_vm1, %v3546_v14  ;;  %v1369_v4 = vsel %vm1364_vm5, %v1366_v53, %v1368_v62  ;;  %v3561_v5 = vrot.slane %v6865_v63, 2  ;;  %v1384_v53 = vrot.slane %v6880_v46, 1  ;;  %v5153_v62 = vld [vmem:[%s7854_s2 + $0x8] sm:$0xff]  ;;  %v4065_v63 = vshrl.u32 %v6886_v51, 16 }
  0x86   : > { %v3562_v14 = vsel %vm3032_vm3, %v3559_v2, %v3561_v5  ;;  %v1385_v1 = vsel %vm1364_vm5, %v1382_v42, %v1384_v53  ;;  %v4057_v2 = vshrl.u32 %v6885_v54, 16  ;;  %v4067_v13 = vrot.slane %v4065_v63, 2 }
  0x8b   : > { %6196 = vmatmul.mubr.msk.bf16.gmra.mrb[24].mxu1 %vm337_vm1, %v857_v20  ;;  %6362 = vmatmul.mubr.msk.bf16.vlgmr.msra.gmra.mrb[0].mxu0 %vm337_vm1, %v3548_v30  ;;  %v3565_v20 = vrot.slane %v6869_v15, 2  ;;  %v3567_v30 = vrot.slane %v6871_v25, 2  ;;  %v6888_v15 = vld [vmem:[%s7026_s28 + $0x20] sm:$0xff]  }
  0x8c   : > { %6199 = vmatprep.mubr.msk.bf16.mxu1 %vm337_vm1, %v865_v24  ;;  %6398 = vmatpush3.bf16.msra.mxu0 %v4281_v33  ;;  %v3564_v24 = vsel %vm3032_vm3, %v3561_v5, %v3563_v17  ;;  %v3569_v33 = vrot.slane %v6873_v28, 2  ;;  %v3577_v5 = vrot.slane %v7338_v58, 2  ;;  %v4074_v25 = vshrl.u32 %v6888_v15, 16 }
  0x8d   : > { %6365 = vmatprep.mubr.msk.bf16.mxu0 %vm337_vm1, %v3550_v34  ;;  %6772 = vmatprep.subr.msk.bf16.mxu0 %vm392_vm0, %v7251_v38  ;;  %v3566_v27 = vsel %vm3032_vm3, %v3563_v17, %v3565_v20  ;;  %v1379_v34 = vsel %vm1364_vm5, %v1376_v26, %v1378_v29  ;;  %v3568_v39 = vsel %vm3032_vm3, %v3565_v20, %v3567_v30  ;;  %v4059_v17 = vrot.slane %v4057_v2, 2  ;;  %v6889_v26 = vld [vmem:[%s7026_s28 + $0x70] sm:$0xff]  }
  0x8e   : > { %v4062_v20 = vrot.slane %v4060_v9, 3  ;;  %v4793_v9 = vsel %vm392_vm0, %v7251_v38, 0  ;;  %v5167_v38 = vld [vmem:[%s7854_s2 + $0x78] sm:$0xff] }
  0x93   : > { %6200 = vmatmul.mubr.msk.bf16.gmra.mrb[28].mxu1 %vm337_vm1, %v873_v57  ;;  %6366 = vmatmul.mubr.msk.bf16.gmra.mrb[4].mxu0 %vm337_vm1, %v3552_v48  ;;  %v3570_v57 = vsel %vm3032_vm3, %v3567_v30, %v3569_v33  ;;  %v1383_v48 = vsel %vm1364_vm5, %v1380_v7, %v1382_v42  ;;  %v4077_v30 = vshll.u32 %v6888_v15, 16  ;;  %v1392_v7 = vrot.slane %v6889_v26, 1  ;;  %v5169_v26 = vld [vmem:[%s7854_s2 + $0x88] sm:$0xff] }
  0x94   : > { %6203 = vmatprep.mubr.msk.bf16.mxu1 %vm337_vm1, %v881_v44  ;;  %6369 = vmatprep.mubr.msk.bf16.mxu0 %vm337_vm1, %v3554_v50  ;;  %v3571_v44 = vrot.slane %v6875_v37, 2  ;;  %v6879_v50 = vld [vmem:[%s7026_s28 + $0x90] sm:$0xff]   ;;  %v5160_v37 = vld [vmem:[%s7854_s2 + $0x40] sm:$0xff] }
  0x95   : > { %v4079_v43 = vrot.slane %v4077_v30, 3 }
  0x96   : > { %v3572_v52 = vsel %vm3032_vm3, %v3569_v33, %v3571_v44  ;;  %v3574_v56 = vsel %vm3032_vm3, %v3571_v44, %v3573_v47  ;;  %v6894_v44 = vld [vmem:[%s7026_s28 + $0x38] sm:$0xff]  }
  0x97   : > { %v4104_v58 = vshll.u32 %v6894_v44, 16 }
  0x9b   : > { %6204 = vmatmul.mubr.msk.bf16.gmra.mrb[32].mxu1 %vm337_vm1, %v889_v55  ;;  %6370 = vmatmul.mubr.msk.bf16.gmra.mrb[8].mxu0 %vm337_vm1, %v3556_v61  ;;  %v5152_v55 = vld [vmem:[%s7854_s2] sm:$0xff]  ;;  %v3575_v61 = vrot.slane %v6879_v50, 2 }
  0x9c   : > { %6209 = vmatprep.mubr.msk.bf16.mxu1 %vm337_vm1, %v1367_v59  ;;  %6373 = vmatprep.mubr.msk.bf16.mxu0 %vm337_vm1, %v3558_v0  ;;  %v1386_v59 = vrot.slane %v6882_v49, 1  ;;  %v4068_v0 = vshll.u32 %v6886_v51, 16  ;;  %v5162_v49 = vld [vmem:[%s7854_s2 + $0x50] sm:$0xff] }
  0x9d   : > { %5190 = vperm.xlu0 %6784, %v5152_v55   ;;  %v3578_v19 = vsel %vm3032_vm3, %v3575_v61, %v3577_v5 }
  0x9e   : > { %v1387_v6 = vsel %vm1364_vm5, %v1384_v53, %v1386_v59  ;;  %v5163_v53 = vld [vmem:[%s7854_s2 + $0x58] sm:$0xff] }
  0xa1   : > { %5195 = vperm.xlu0 %6784, %v5153_v62  }
  0xa3   : > { %6210 = vmatmul.mubr.msk.bf16.vlgmr.msra.gmra.mrb[0].mxu1 %vm337_vm1, %v1369_v4  ;;  %6374 = vmatmul.mubr.msk.bf16.gmra.mrb[12].mxu0 %vm337_vm1, %v3560_v11  ;;  %v7351_v4 = vld [vmem:[%s7026_s28 + $0x68] sm:$0xff]   ;;  %v1388_v11 = vrot.slane %v6884_v40, 1 }
  0xa4   : > { %6213 = vmatprep.mubr.msk.bf16.mxu1 %vm337_vm1, %v1371_v8  ;;  %6246 = vmatpush3.bf16.msra.mxu1 %v1968_v10  ;;  %v6883_v8 = vld [vmem:[%s7026_s28 + $0xa0] ss:$0 sps:$4 sm:$0x33]   ;;  %v5155_v10 = vld [vmem:[%s7854_s2 + $0x18] sm:$0xff] }
  0xa5   : > { %6768 = vmatprep.subr.msk.bf16.mxu1 %vm392_vm0, %v6956_v22  ;;  %6377 = vmatprep.mubr.msk.bf16.mxu0 %vm337_vm1, %v3562_v14  ;;  %v4070_v14 = vrot.slane %v4068_v0, 3  ;;  %v3576_v22 = vsel %vm3032_vm3, %v3573_v47, %v3575_v61  ;;  %v1389_v28 = vsel %vm1364_vm5, %v1386_v59, %v1388_v11  ;;  %v5164_v61 = vld [vmem:[%s7854_s2 + $0x60] sm:$0xff] }
  0xa6   : > { %5205 = vperm.xlu1 %6785, %v5155_v10   ;;  %5210 = vperm.xlu0 %6784, %v5156_v12   ;;  %v6896_v0 = vld [vmem:[%s7026_s28 + $0x40] sm:$0xff]   ;;  %v5166_v12 = vld [vmem:[%s7854_s2 + $0x70] sm:$0xff] }
  0xa7   : > { %v4071_v29 = vor.u32 %v4070_v14, %v4067_v13  ;;  %v4110_v14 = vshrl.u32 %v6896_v0, 16  ;;  %v4113_v15 = vshll.u32 %v6896_v0, 16 }
  0xaa   : > { %5215 = vperm.xlu1 %6785, %v5157_v16   ;;  %5220 = vperm.xlu0 %6784, %v5158_v23   ;;  %v6900_v23 = vld [vmem:[%s7026_s28 + $0x10] sm:$0xff]  }
  0xab   : > { %6214 = vmatmul.mubr.msk.bf16.gmra.mrb[4].mxu1 %vm337_vm1, %v1373_v18  ;;  %6378 = vmatmul.mubr.msk.bf16.gmra.mrb[16].mxu0 %vm337_vm1, %v3564_v24  ;;  %v1390_v18 = vrot.slane %v7351_v4, 1  ;;  %v3579_v24 = vrot.slane %v6883_v8, 2  ;;  %v6898_v8 = vld [vmem:[%s7026_s28 + $0x48] sm:$0xff]  }
  0xac   : > { %6217 = vmatprep.mubr.msk.bf16.mxu1 %vm337_vm1, %v1375_v21  ;;  %6381 = vmatprep.mubr.msk.bf16.mxu0 %vm337_vm1, %v3566_v27  ;;  %v6890_v21 = vld [vmem:[%s7026_s28 + $0x28] sm:$0xff]   ;;  %v5159_v27 = vld [vmem:[%s7854_s2 + $0x38] sm:$0xff] }
  0xad   : > { %v1391_v32 = vsel %vm1364_vm5, %v1388_v11, %v1390_v18  ;;  %v4083_v33 = vshrl.u32 %v6890_v21, 16  ;;  %v3580_v42 = vsel %vm3032_vm3, %v3577_v5, %v3579_v24  ;;  %v1393_v55 = vsel %vm1364_vm5, %v1390_v18, %v1392_v7  ;;  %v5168_v24 = vld [vmem:[%s7854_s2 + $0x80] sm:$0xff] }
  0xae   : > { %5225 = vperm.xlu1 %6785, %v5159_v27   ;;  %5230 = vperm.xlu0 %6784, %v5160_v37   ;;  %v1398_v11 = vrot.slane %v6895_v60, 1  ;;  %v4119_v18 = vshrl.u32 %v6898_v8, 16  ;;  %v6903_v37 = vld [vmem:[%s7026_s28 + $0x58] sm:$0xff]  }
  0xaf   : > { %v4085_v46 = vrot.slane %v4083_v33, 2 }
  0xb2   : > { %5235 = vperm.xlu1 %6785, %v5161_v41   ;;  %5240 = vperm.xlu0 %6784, %v5162_v49   ;;  %v6904_v49 = vld [vmem:[%s7026_s28 + $0x20] sm:$0xff]  }
  0xb3   : > { %6218 = vmatmul.mubr.msk.bf16.gmra.mrb[8].mxu1 %vm337_vm1, %v1377_v31  ;;  %6382 = vmatmul.mubr.msk.bf16.gmra.mrb[20].mxu0 %vm337_vm1, %v3568_v39  ;;  %v4063_v31 = vor.u32 %v4062_v20, %v4059_v17  ;;  %v4076_v39 = vrot.slane %v4074_v25, 2  ;;  %v6897_v17 = vld [vmem:[%s7026_s28 + $0x90] ss:$0 sps:$4 sm:$0x11]   ;;  %v1881_v60 = vrot.slane %v6904_v49, 1 }
  0xb4   : > { %6221 = vmatprep.mubr.msk.bf16.mxu1 %vm337_vm1, %v1379_v34  ;;  %6385 = vmatprep.mubr.msk.bf16.mxu0 %vm337_vm1, %v3570_v57  ;;  %v4086_v34 = vshll.u32 %v6890_v21, 16  ;;  %v6892_v57 = vld [vmem:[%s7026_s28 + $0x30] sm:$0xff]   ;;  %v4122_v21 = vshll.u32 %v6898_v8, 16  ;;  %v1400_v30 = vrot.slane %v6897_v17, 1 }
  0xb5   : > { %v4092_v50 = vshrl.u32 %v6892_v57, 16  ;;  %v4095_v51 = vshll.u32 %v6892_v57, 16  ;;  %v4080_v54 = vor.u32 %v4079_v43, %v4076_v39  ;;  %v5170_v39 = vld [vmem:[%s7854_s2 + $0x90] sm:$0xff] }
  0xb6   : > { %v4088_v47 = vrot.slane %v4086_v34, 3  ;;  %5245 = vperm.xlu1 %6785, %v5163_v53   ;;  %5250 = vperm.xlu0 %6784, %v5164_v61   ;;  %v4124_v33 = vrot.slane %v4122_v21, 3  ;;  %v1401_v41 = vsel %vm1364_vm5, %v1398_v11, %v1400_v30  ;;  %v6907_v61 = vld [vmem:[%s7026_s28 + $0x68] sm:$0xff]   ;;  %v6911_v21 = vld [vmem:[%s7026_s28 + $0x78] sm:$0xff]  }
  0xb7   : > { %v4094_v62 = vrot.slane %v4092_v50, 2  ;;  %v4097_v63 = vrot.slane %v4095_v51, 3  ;;  %v4081_v2 = vsel %vm4055_vm6, %v4071_v29, %v4080_v54  ;;  %v5172_v50 = vld [vmem:[%s7854_s2 + $0xa0] sm:$0xff]  ;;  %v5173_v51 = vld [vmem:[%s7854_s2 + $0xa8] sm:$0xff] }
  0xb8   : > { %v4089_v59 = vor.u32 %v4088_v47, %v4085_v46  ;;  %v4137_v47 = vshrl.u32 %v6903_v37, 16 }
  0xb9   : > { %v4098_v13 = vor.u32 %v4097_v63, %v4094_v62  ;;  %v5174_v62 = vld [vmem:[%s7854_s2 + $0xb0] sm:$0xff]  ;;  %v5175_v63 = vld [vmem:[%s7854_s2 + $0xb8] sm:$0xff] }
  0xba   : > { %v4090_v10 = vsel %vm4055_vm6, %v4080_v54, %v4089_v59  ;;  %5260 = vperm.xlu0 %6784, %v5166_v12   ;;  %v5176_v12 = vld [vmem:[%s7854_s2 + $0xc0] sm:$0xff] }
  0xbb   : > { %6222 = vmatmul.mubr.msk.bf16.gmra.mrb[12].mxu1 %vm337_vm1, %v1381_v45  ;;  %6386 = vmatmul.mubr.msk.bf16.gmra.mrb[24].mxu0 %vm337_vm1, %v3572_v52  ;;  %v4072_v45 = vsel %vm4055_vm6, %v4063_v31, %v4071_v29  ;;  %v6893_v52 = vld [vmem:[%s7026_s28 + $0x80] sm:$0xff]   ;;  %v4099_v25 = vsel %vm4055_vm6, %v4089_v59, %v4098_v13  ;;  %v4115_v29 = vrot.slane %v4113_v15, 3  ;;  %v6901_v31 = vld [vmem:[%s7026_s28 + $0x50] sm:$0xff]   ;;  %v4139_v59 = vrot.slane %v4137_v47, 2 }
  0xbc   : > { %6225 = vmatprep.mubr.msk.bf16.mxu1 %vm337_vm1, %v1383_v48  ;;  %6389 = vmatprep.mubr.msk.bf16.mxu0 %vm337_vm1, %v3574_v56  ;;  %v1394_v48 = vrot.slane %v6891_v35, 1  ;;  %v4101_v56 = vshrl.u32 %v6894_v44, 16  ;;  %v1396_v4 = vrot.slane %v6893_v52, 1  ;;  %v1877_v35 = vrot.slane %v6900_v23, 1  ;;  %v6902_v44 = vld [vmem:[%s7026_s28 + $0x18] sm:$0xff]   ;;  %v5178_v23 = vld [vmem:[%s7854_s2 + $0xd0] sm:$0xff] }
  0xbd   : > { %v4131_v43 = vshll.u32 %v6901_v31, 16  ;;  %v5182_v47 = vld [vmem:[%s7854_s2 + $0xf0] sm:$0xff] }
  0xbe   : > { %v1395_v40 = vsel %vm1364_vm5, %v1392_v7, %v1394_v48  ;;  %v4103_v5 = vrot.slane %v4101_v56, 2  ;;  %v1397_v16 = vsel %vm1364_vm5, %v1394_v48, %v1396_v4  ;;  %v1399_v20 = vsel %vm1364_vm5, %v1396_v4, %v1398_v11  ;;  %5270 = vperm.xlu0 %6784, %v5168_v24   ;;  %v5171_v7 = vld [vmem:[%s7854_s2 + $0x98] sm:$0xff]  ;;  %v6905_v56 = vld [vmem:[%s7026_s28 + $0x60] sm:$0xff]   ;;  %v6908_v11 = vld [vmem:[%s7026_s28 + $0x30] sm:$0xff]  }
  0xbf   : > { %v4140_v48 = vshll.u32 %v6903_v37, 16  ;;  %v4133_v54 = vrot.slane %v4131_v43, 3  ;;  %v4149_v4 = vshll.u32 %v6905_v56, 16 }
  0xc2   : > { %5280 = vperm.xlu0 %6784, %v5170_v39  }
  0xc3   : > { %6226 = vmatmul.mubr.msk.bf16.gmra.mrb[16].mxu1 %vm337_vm1, %v1385_v1  ;;  %6390 = vmatmul.mubr.msk.bf16.gmra.mrb[28].mxu0 %vm337_vm1, %v3576_v22  ;;  %v5165_v1 = vld [vmem:[%s7854_s2 + $0x68] sm:$0xff] }
  0xc4   : > { %6229 = vmatprep.mubr.msk.bf16.mxu1 %vm337_vm1, %v1387_v6  ;;  %6393 = vmatprep.mubr.msk.bf16.mxu0 %vm337_vm1, %v3578_v19  ;;  %v4106_v6 = vrot.slane %v4104_v58, 3  ;;  %v6899_v19 = vld [vmem:[%s7026_s28 + $0x8] sm:$0xfe]  }
  0xc5   : > { %5255 = vperm.xlu1 %6785, %v5165_v1   ;;  %v1876_v34 = vrot.slane %v6899_v19, 1 }
  0xc6   : > { %v4107_v22 = vor.u32 %v4106_v6, %v4103_v5  ;;  %5290 = vperm.xlu0 %6784, %v5172_v50   ;;  %v6906_v5 = vld [vmem:[%s7026_s28 + $0x28] sm:$0xff]  }
  0xc7   : > { %v1878_v46 = vsel %vm1364_vm5, %v1876_v34, %v1877_v35  ;;  %v5180_v34 = vld [vmem:[%s7854_s2 + $0xe0] sm:$0xff] }
  0xc8   : > { %v4108_v27 = vsel %vm4055_vm6, %v4098_v13, %v4107_v22  ;;  %v5177_v13 = vld [vmem:[%s7854_s2 + $0xc8] sm:$0xff] }
  0xc9   : > { %5265 = vperm.xlu1 %6785, %v5167_v38   ;;  %v4151_v38 = vrot.slane %v4149_v4, 3 }
  0xca   : > { %5300 = vperm.xlu0 %6784, %v5174_v62  }
  0xcb   : > { %6230 = vmatmul.mubr.msk.bf16.gmra.mrb[20].mxu1 %vm337_vm1, %v1389_v28  ;;  %6394 = vmatmul.mubr.msk.bf16.gmra.mrb[32].mxu0 %vm337_vm1, %v3580_v42  ;;  %v4112_v28 = vrot.slane %v4110_v14, 2  ;;  %v4128_v42 = vshrl.u32 %v6901_v31, 16  ;;  %v4173_v31 = vshrl.u32 %v6911_v21, 16 }
  0xcc   : > { %6233 = vmatprep.mubr.msk.bf16.mxu1 %vm337_vm1, %v1391_v32  ;;  %6399 = vmatprep.mubr.msk.bf16.mxu0 %vm337_vm1, %v4072_v45  ;;  %v4121_v32 = vrot.slane %v4119_v18, 2 }
  0xcd   : > { %5275 = vperm.xlu1 %6785, %v5169_v26   ;;  %v4116_v57 = vor.u32 %v4115_v29, %v4112_v28  ;;  %v4130_v53 = vrot.slane %v4128_v42, 2  ;;  %v6910_v28 = vld [vmem:[%s7026_s28 + $0x38] sm:$0xff]   ;;  %v4175_v43 = vrot.slane %v4173_v31, 2 }
  0xce   : > { %v4125_v45 = vor.u32 %v4124_v33, %v4121_v32  ;;  %5310 = vperm.xlu0 %6784, %v5176_v12   ;;  %v4176_v32 = vshll.u32 %v6911_v21, 16  ;;  %v6912_v33 = vld [vmem:[%s7026_s28 + $0x40] sm:$0xff]  }
  0xcf   : > { %v4117_v52 = vsel %vm4055_vm6, %v4107_v22, %v4116_v57  ;;  %v4134_v0 = vor.u32 %v4133_v54, %v4130_v53  ;;  %v6909_v22 = vld [vmem:[%s7026_s28 + $0x70] sm:$0xff]   ;;  %v6914_v53 = vld [vmem:[%s7026_s28 + $0x48] sm:$0xff]  }
  0xd0   : > { %v4126_v58 = vsel %vm4055_vm6, %v4116_v57, %v4125_v45  ;;  %v4164_v26 = vshrl.u32 %v6909_v22, 16  ;;  %v1887_v57 = vrot.slane %v6910_v28, 1 }
  0xd1   : > { %5285 = vperm.xlu1 %6785, %v5171_v7   ;;  %v4135_v14 = vsel %vm4055_vm6, %v4125_v45, %v4134_v0  ;;  %v1889_v45 = vrot.slane %v6912_v33, 1 }
  0xd2   : > { %5320 = vperm.xlu0 %6784, %v5178_v23   ;;  %v4166_v39 = vrot.slane %v4164_v26, 2 }
  0xd3   : > { %6234 = vmatmul.mubr.msk.bf16.gmra.mrb[24].mxu1 %vm337_vm1, %v1393_v55  ;;  %6400 = vmatmul.mubr.msk.bf16.vlgmr.msra.gmra.mrb[0].mxu0 %vm337_vm1, %v4081_v2  ;;  %v1879_v55 = vrot.slane %v6902_v44, 1  ;;  %v4146_v2 = vshrl.u32 %v6905_v56, 16  ;;  %v4178_v44 = vrot.slane %v4176_v32, 3  ;;  %v6922_v32 = vld [vmem:[%s7026_s28 + $0x68] sm:$0xff]  }
  0xd4   : > { %6237 = vmatprep.mubr.msk.bf16.mxu1 %vm337_vm1, %v1395_v40  ;;  %6436 = vmatpush3.bf16.msra.mxu0 %v4793_v9  ;;  %v4142_v40 = vrot.slane %v4140_v48, 3  ;;  %v4155_v9 = vshrl.u32 %v6907_v61, 16  ;;  %v5183_v48 = vld [vmem:[%s7854_s2 + $0xf8] sm:$0xff] }
  0xd5   : > { %6403 = vmatprep.mubr.msk.bf16.mxu0 %vm337_vm1, %v4090_v10  ;;  %5295 = vperm.xlu1 %6785, %v5173_v51   ;;  %v1880_v1 = vsel %vm1364_vm5, %v1877_v35, %v1879_v55  ;;  %v1882_v8 = vsel %vm1364_vm5, %v1879_v55, %v1881_v60  ;;  %v4158_v10 = vshll.u32 %v6907_v61, 16  ;;  %v4148_v15 = vrot.slane %v4146_v2, 2  ;;  %v5181_v35 = vld [vmem:[%s7854_s2 + $0xe8] sm:$0xff] }
  0xd6   : > { %v4143_v6 = vor.u32 %v4142_v40, %v4139_v59  ;;  %v4157_v18 = vrot.slane %v4155_v9, 2  ;;  %5330 = vperm.xlu0 %6784, %v5180_v34   ;;  %v4179_v54 = vor.u32 %v4178_v44, %v4175_v43  ;;  %v1890_v55 = vsel %vm1364_vm5, %v1887_v57, %v1889_v45  ;;  %v6916_v59 = vld [vmem:[%s7026_s28 + $0x50] sm:$0xff]   ;;  %v5184_v40 = vld [vmem:[%s7854_s2 + $0x100] sm:$0xff]  ;;  %v6924_v43 = vld [vmem:[%s7026_s28 + $0x18] sm:$0xff]  }
  0xd7   : > { %v4160_v19 = vrot.slane %v4158_v10, 3  ;;  %v4152_v24 = vor.u32 %v4151_v38, %v4148_v15  ;;  %v5186_v9 = vld [vmem:[%s7854_s2 + $0x110] sm:$0xff]  ;;  %v5187_v10 = vld [vmem:[%s7854_s2 + $0x118] sm:$0xff] }
  0xd8   : > { %v4144_v17 = vsel %vm4055_vm6, %v4134_v0, %v4143_v6  ;;  %v1891_v0 = vrot.slane %v6914_v53, 1  ;;  %v6918_v15 = vld [vmem:[%s7026_s28 + $0x58] sm:$0xff]   ;;  %v6926_v53 = vld [vmem:[%s7026_s28 + $0x20] sm:$0xff]  }
  0xd9   : > { %5305 = vperm.xlu1 %6785, %v5175_v63   ;;  %v4161_v29 = vor.u32 %v4160_v19, %v4157_v18  ;;  %v4153_v37 = vsel %vm4055_vm6, %v4143_v6, %v4152_v24  ;;  %v1893_v6 = vrot.slane %v6916_v59, 1  ;;  %v6920_v18 = vld [vmem:[%s7026_s28 + $0x60] sm:$0xff]   ;;  %v1895_v23 = vrot.slane %v6918_v15, 1 }
  0xda   : > { %5340 = vperm.xlu0 %6784, %v5182_v47   ;;  %v1892_v12 = vsel %vm1364_vm5, %v1889_v45, %v1891_v0  ;;  %v6927_v47 = vld [vmem:[%s7026_s28 + $0x78] sm:$0xff]   ;;  %v4704_v59 = vrot.slane %v6926_v53, 3 }
  0xdb   : > { %6238 = vmatmul.mubr.msk.bf16.gmra.mrb[28].mxu1 %vm337_vm1, %v1397_v16  ;;  %6404 = vmatmul.mubr.msk.bf16.gmra.mrb[4].mxu0 %vm337_vm1, %v4099_v25  ;;  %v1883_v16 = vrot.slane %v6906_v5, 1  ;;  %v4162_v42 = vsel %vm4055_vm6, %v4152_v24, %v4161_v29 }
  0xdc   : > { %6241 = vmatprep.mubr.msk.bf16.mxu1 %vm337_vm1, %v1399_v20  ;;  %6407 = vmatprep.mubr.msk.bf16.mxu0 %vm337_vm1, %v4108_v27  ;;  %v1885_v20 = vrot.slane %v6908_v11, 1  ;;  %v4167_v27 = vshll.u32 %v6909_v22, 16 }
  0xdd   : > { %5315 = vperm.xlu1 %6785, %v5177_v13   ;;  %v1884_v25 = vsel %vm1364_vm5, %v1881_v60, %v1883_v16  ;;  %v5185_v60 = vld [vmem:[%s7854_s2 + $0x108] sm:$0xff] }
  0xde   : > { %v1886_v30 = vsel %vm1364_vm5, %v1883_v16, %v1885_v20  ;;  %v4169_v7 = vrot.slane %v4167_v27, 3  ;;  %v1888_v50 = vsel %vm1364_vm5, %v1885_v20, %v1887_v57  ;;  %5350 = vperm.xlu0 %6784, %v5184_v40   ;;  %v1894_v16 = vsel %vm1364_vm5, %v1891_v0, %v1893_v6  ;;  %v6937_v0 = vld [vmem:[%s7026_s28 + $0x60] sm:$0xff]  }
  0xdf   : > { %v1897_v27 = vrot.slane %v6920_v18, 1  ;;  %v1899_v57 = vrot.slane %v6922_v32, 1  ;;  %v6943_v32 = vld [vmem:[%s7026_s28 + $0x78] sm:$0xff]  }
  0xe0   : > { %v4170_v49 = vor.u32 %v4169_v7, %v4166_v39 }
  0xe1   : > { %v1898_v34 = vsel %vm1364_vm5, %v1895_v23, %v1897_v27 }
  0xe2   : > { %v4171_v61 = vsel %vm4055_vm6, %v4161_v29, %v4170_v49  ;;  %v4180_v2 = vsel %vm4055_vm6, %v4170_v49, %v4179_v54  ;;  %5360 = vperm.xlu0 %6784, %v5186_v9   ;;  %v1896_v29 = vsel %vm1364_vm5, %v1893_v6, %v1895_v23  ;;  %v4702_v49 = vrot.slane %v6924_v43, 3  ;;  %v6932_v6 = vld [vmem:[%s7026_s28 + $0x38] sm:$0xff]  }
  0xe3   : > { %6242 = vmatmul.mubr.msk.bf16.gmra.mrb[32].mxu1 %vm337_vm1, %v1401_v41  ;;  %6408 = vmatmul.mubr.msk.bf16.gmra.mrb[8].mxu0 %vm337_vm1, %v4117_v52  ;;  %v6913_v41 = vld [vmem:[%s7026_s28 + $0x80] sm:$0xff]   ;;  %v2487_v9 = vshrl.u32 %v6937_v0, 16  ;;  %v4710_v15 = vrot.slane %v6932_v6, 3  ;;  %v2517_v43 = vshll.u32 %v6943_v32, 16 }
  0xe4   : > { %6247 = vmatprep.mubr.msk.bf16.mxu1 %vm337_vm1, %v1878_v46  ;;  %6411 = vmatprep.mubr.msk.bf16.mxu0 %vm337_vm1, %v4126_v58  ;;  %v6915_v46 = vld [vmem:[%s7026_s28 + $0x88] sm:$0xff]   ;;  %v4182_v51 = vshrl.u32 %v6913_v41, 16  ;;  %v4185_v52 = vshll.u32 %v6913_v41, 16 }
  0xe5   : > { %v4191_v56 = vshrl.u32 %v6915_v46, 16  ;;  %v4194_v58 = vshll.u32 %v6915_v46, 16  ;;  %v1900_v46 = vsel %vm1364_vm5, %v1897_v27, %v1899_v57 }
  0xe6   : > { %v4184_v62 = vrot.slane %v4182_v51, 2  ;;  %v4187_v63 = vrot.slane %v4185_v52, 3  ;;  %v6929_v51 = vld [vmem:[%s7026_s28 + $0x80] sm:$0xff]  }
  0xe7   : > { %v4193_v4 = vrot.slane %v4191_v56, 2  ;;  %v4196_v5 = vrot.slane %v4194_v58, 3  ;;  %v6928_v56 = vld [vmem:[%s7026_s28 + $0x28] sm:$0xff]   ;;  %v1905_v58 = vrot.slane %v6929_v51, 1  ;;  %v2519_v51 = vrot.slane %v2517_v43, 2 }
  0xe8   : > { %v4188_v11 = vor.u32 %v4187_v63, %v4184_v62  ;;  %v6933_v63 = vld [vmem:[%s7026_s28 + $0x90] sm:$0xff]   ;;  %v6955_v43 = vld [vmem:[%s7026_s28 + $0xa0] ss:$0 sps:$4 sm:$0x77]  }
  0xe9   : > { %v4197_v38 = vor.u32 %v4196_v5, %v4193_v4 }
  0xea   : > { %v4189_v19 = vsel %vm4055_vm6, %v4179_v54, %v4188_v11  ;;  %v1903_v54 = vrot.slane %v6927_v47, 1 }
  0xeb   : > { %6248 = vmatmul.mubr.msk.bf16.vlgmr.msra.gmra.mrb[0].mxu1 %vm337_vm1, %v1880_v1  ;;  %6412 = vmatmul.mubr.msk.bf16.gmra.mrb[12].mxu0 %vm337_vm1, %v4135_v14  ;;  %v6917_v1 = vld [vmem:[%s7026_s28 + $0x90] sm:$0xff]   ;;  %v4198_v24 = vsel %vm4055_vm6, %v4188_v11, %v4197_v38 }
  0xec   : > { %6251 = vmatprep.mubr.msk.bf16.mxu1 %vm337_vm1, %v1882_v8  ;;  %6474 = vmatpush3.bf16.msra.mxu1 %v7011_v3  ;;  %v5179_v3 = vld [vmem:[%s7854_s2 + $0xd8] sm:$0xff]  ;;  %v4200_v13 = vshrl.u32 %v6917_v1, 16  ;;  %v4203_v14 = vshll.u32 %v6917_v1, 16  ;;  %v1906_v62 = vsel %vm1364_vm5, %v1903_v54, %v1905_v58  ;;  %v4705_v1 = vsel %vm4700_vm7, %v4702_v49, %v4704_v59 }
  0xed   : > { %6415 = vmatprep.mubr.msk.bf16.mxu0 %vm337_vm1, %v4144_v17  ;;  %5325 = vperm.xlu1 %6785, %v5179_v3   ;;  %v6919_v8 = vld [vmem:[%s7026_s28 + $0x98] sm:$0xff]   ;;  %v6921_v3 = vld [vmem:[%s7026_s28 + $0xa0] ss:$0 sps:$4 sm:$0x77]  }
  0xee   : > { %v4209_v22 = vshrl.u32 %v6919_v8, 16  ;;  %v4212_v17 = vshll.u32 %v6919_v8, 16  ;;  %v4202_v20 = vrot.slane %v4200_v13, 2  ;;  %v4205_v21 = vrot.slane %v4203_v14, 3  ;;  %v6939_v14 = vld [vmem:[%s7026_s28 + $0x68] sm:$0xff]  }
  0xef   : > { %v4221_v31 = vshll.u32 %v6921_v3, 16  ;;  %v1909_v8 = vrot.slane %v6933_v63, 1  ;;  %v6935_v13 = vld [vmem:[%s7026_s28 + $0x98] ss:$0 sps:$4 sm:$0x11]   ;;  %v2499_v23 = vshll.u32 %v6939_v14, 16 }
  0xf0   : > { %v4214_v26 = vrot.slane %v4212_v17, 3  ;;  %v4206_v28 = vor.u32 %v4205_v21, %v4202_v20  ;;  %v6941_v17 = vld [vmem:[%s7026_s28 + $0x70] sm:$0xff]   ;;  %v1911_v20 = vrot.slane %v6935_v13, 1  ;;  %v2496_v21 = vshrl.u32 %v6939_v14, 16 }
  0xf1   : > { %5335 = vperm.xlu1 %6785, %v5181_v35   ;;  %v6925_v35 = vld [vmem:[%s7026_s28 + $0x70] sm:$0xff]   ;;  %v4223_v7 = vrot.slane %v4221_v31, 3  ;;  %v2508_v27 = vshll.u32 %v6941_v17, 16  ;;  %v2501_v31 = vrot.slane %v2499_v23, 2 }
  0xf2   : > { %v1901_v44 = vrot.slane %v6925_v35, 1 }
  0xf3   : > { %6252 = vmatmul.mubr.msk.bf16.gmra.mrb[4].mxu1 %vm337_vm1, %v1884_v25  ;;  %6416 = vmatmul.mubr.msk.bf16.gmra.mrb[16].mxu0 %vm337_vm1, %v4153_v37  ;;  %v4211_v25 = vrot.slane %v4209_v22, 2  ;;  %v4207_v37 = vsel %vm4055_vm6, %v4197_v38, %v4206_v28 }
  0xf4   : > { %6255 = vmatprep.mubr.msk.bf16.mxu1 %vm337_vm1, %v1886_v30  ;;  %6419 = vmatprep.mubr.msk.bf16.mxu0 %vm337_vm1, %v4162_v42  ;;  %v4218_v30 = vshrl.u32 %v6921_v3, 16  ;;  %v6923_v42 = vld [vmem:[%s7026_s28 + $0x10] sm:$0xf8]   ;;  %v1904_v40 = vsel %vm1364_vm5, %v1901_v44, %v1903_v54 }
  0xf5   : > { %5345 = vperm.xlu1 %6785, %v5183_v48   ;;  %v4215_v33 = vor.u32 %v4214_v26, %v4211_v25  ;;  %v4701_v48 = vrot.slane %v6923_v42, 3  ;;  %v2505_v26 = vshrl.u32 %v6941_v17, 16  ;;  %v2514_v42 = vshrl.u32 %v6943_v32, 16 }
  0xf6   : > { %v4220_v39 = vrot.slane %v4218_v30, 2  ;;  %v2498_v30 = vrot.slane %v2496_v21, 1 }
  0xf7   : > { %v4216_v41 = vsel %vm4055_vm6, %v4206_v28, %v4215_v33  ;;  %v2507_v35 = vrot.slane %v2505_v26, 1 }
  0xf8   : > { %v4224_v45 = vor.u32 %v4223_v7, %v4220_v39  ;;  %v6945_v39 = vld [vmem:[%s7026_s28 + $0x80] sm:$0xff]  }
  0xf9   : > { %5355 = vperm.xlu1 %6785, %v5185_v60   ;;  %v6931_v60 = vld [vmem:[%s7026_s28 + $0x88] sm:$0xff]   ;;  %v2526_v47 = vshll.u32 %v6945_v39, 16 }
  0xfa   : > { %v4225_v52 = vsel %vm4055_vm6, %v4215_v33, %v4224_v45  ;;  %v1907_v4 = vrot.slane %v6931_v60, 1  ;;  %v6940_v45 = vld [vmem:[%s7026_s28 + $0x58] sm:$0xff]  }
  0xfb   : > { %6256 = vmatmul.mubr.msk.bf16.gmra.mrb[8].mxu1 %vm337_vm1, %v1888_v50  ;;  %6420 = vmatmul.mubr.msk.bf16.gmra.mrb[20].mxu0 %vm337_vm1, %v4171_v61  ;;  %v1902_v50 = vsel %vm1364_vm5, %v1899_v57, %v1901_v44  ;;  %v4706_v61 = vrot.slane %v6928_v56, 3  ;;  %v6938_v57 = vld [vmem:[%s7026_s28 + $0x50] sm:$0xff]   ;;  %v4718_v53 = vrot.slane %v6940_v45, 3  ;;  %v2528_v56 = vrot.slane %v2526_v47, 2 }
  0xfc   : > { %6259 = vmatprep.mubr.msk.bf16.mxu1 %vm337_vm1, %v1890_v55  ;;  %6423 = vmatprep.mubr.msk.bf16.mxu0 %vm337_vm1, %v4180_v2  ;;  %v4703_v55 = vsel %vm4700_vm7, %v4701_v48, %v4702_v49  ;;  %v6930_v2 = vld [vmem:[%s7026_s28 + $0x30] sm:$0xff]   ;;  %v1910_v38 = vsel %vm1364_vm5, %v1907_v4, %v1909_v8  ;;  %v4716_v48 = vrot.slane %v6938_v57, 3  ;;  %v4736_v45 = vrot.slane %v6955_v43, 3 }
  0xfd   : > { %5365 = vperm.xlu1 %6785, %v5187_v10   ;;  %v4707_v5 = vsel %vm4700_vm7, %v4704_v59, %v4706_v61  ;;  %v2490_v10 = vshll.u32 %v6937_v0, 16  ;;  %v4708_v11 = vrot.slane %v6930_v2, 3  ;;  %v6944_v0 = vld [vmem:[%s7026_s28 + $0x68] sm:$0xff]  }
  0xfe   : > { %v4719_v63 = vsel %vm4700_vm7, %v4716_v48, %v4718_v53 }
  0xff   : > { %v2492_v22 = vrot.slane %v2490_v10, 2  ;;  %v4709_v18 = vsel %vm4700_vm7, %v4706_v61, %v4708_v11  ;;  %v4711_v3 = vsel %vm4700_vm7, %v4708_v11, %v4710_v15  ;;  %v6951_v10 = vld [vmem:[%s7026_s28 + $0x98] ss:$0 sps:$4 sm:$0x33]   ;;  %v4722_v11 = vrot.slane %v6944_v0, 3 }
 0x100   : > { %v2553_v17 = vshll.u32 %v6951_v10, 16 }
 0x103   : > { %6260 = vmatmul.mubr.msk.bf16.gmra.mrb[12].mxu1 %vm337_vm1, %v1892_v12  ;;  %6424 = vmatmul.mubr.msk.bf16.gmra.mrb[24].mxu0 %vm337_vm1, %v4189_v19  ;;  %v1908_v12 = vsel %vm1364_vm5, %v1905_v58, %v1907_v4  ;;  %v6934_v19 = vld [vmem:[%s7026_s28 + $0x40] sm:$0xff]   ;;  %v6949_v58 = vld [vmem:[%s7026_s28 + $0x90] sm:$0xff]  }
 0x104   : > { %6263 = vmatprep.mubr.msk.bf16.mxu1 %vm337_vm1, %v1894_v16  ;;  %6427 = vmatprep.mubr.msk.bf16.mxu0 %vm337_vm1, %v4198_v24  ;;  %v2489_v16 = vrot.slane %v2487_v9, 1  ;;  %v6936_v24 = vld [vmem:[%s7026_s28 + $0x48] sm:$0xff]   ;;  %v4712_v28 = vrot.slane %v6934_v19, 3  ;;  %v2541_v2 = vshrl.u32 %v6949_v58, 16  ;;  %v2544_v4 = vshll.u32 %v6949_v58, 16  ;;  %v6948_v19 = vld [vmem:[%s7026_s28 + $0x78] sm:$0xff]  }
 0x105   : > { %v4714_v33 = vrot.slane %v6936_v24, 3  ;;  %v2555_v24 = vrot.slane %v2553_v17, 2 }
 0x106   : > { %v2493_v25 = vor.u32 %v2492_v22, %v2489_v16  ;;  %v4713_v7 = vsel %vm4700_vm7, %v4710_v15, %v4712_v28  ;;  %v2543_v13 = vrot.slane %v2541_v2, 1  ;;  %v2546_v14 = vrot.slane %v2544_v4, 2 }
 0x107   : > { %v4715_v44 = vsel %vm4700_vm7, %v4712_v28, %v4714_v33  ;;  %v4717_v59 = vsel %vm4700_vm7, %v4714_v33, %v4716_v48  ;;  %v2550_v22 = vshrl.u32 %v6951_v10, 16  ;;  %v6950_v28 = vld [vmem:[%s7026_s28 + $0x80] sm:$0xff]  }
 0x108   : > { %v4728_v32 = vrot.slane %v6950_v28, 3 }
 0x10b   : > { %6264 = vmatmul.mubr.msk.bf16.gmra.mrb[16].mxu1 %vm337_vm1, %v1896_v29  ;;  %6428 = vmatmul.mubr.msk.bf16.gmra.mrb[28].mxu0 %vm337_vm1, %v4207_v37  ;;  %v1912_v29 = vsel %vm1364_vm5, %v1909_v8, %v1911_v20  ;;  %v2510_v37 = vrot.slane %v2508_v27, 2  ;;  %v2547_v20 = vor.u32 %v2546_v14, %v2543_v13 }
 0x10c   : > { %6267 = vmatprep.mubr.msk.bf16.mxu1 %vm337_vm1, %v1898_v34  ;;  %6431 = vmatprep.mubr.msk.bf16.mxu0 %vm337_vm1, %v4216_v41  ;;  %v2494_v34 = vsel %vm2387_vm2, %v7098_v36, %v2493_v25  ;;  %v2502_v41 = vor.u32 %v2501_v31, %v2498_v30  ;;  %v2523_v36 = vshrl.u32 %v6945_v39, 16  ;;  %v6952_v31 = vld [vmem:[%s7026_s28 + $0x88] sm:$0xff]  }
 0x10e   : > { %v2503_v49 = vsel %vm2387_vm2, %v2493_v25, %v2502_v41  ;;  %v4726_v25 = vrot.slane %v6948_v19, 3 }
 0x113   : > { %6268 = vmatmul.mubr.msk.bf16.gmra.mrb[20].mxu1 %vm337_vm1, %v1900_v46  ;;  %6432 = vmatmul.mubr.msk.bf16.gmra.mrb[32].mxu0 %vm337_vm1, %v4225_v52  ;;  %v2511_v46 = vor.u32 %v2510_v37, %v2507_v35  ;;  %v6947_v52 = vld [vmem:[%s7026_s28 + $0x88] sm:$0xff]   ;;  %v4729_v35 = vsel %vm4700_vm7, %v4726_v25, %v4728_v32  ;;  %v6953_v37 = vld [vmem:[%s7026_s28 + $0x90] sm:$0xff]  }
 0x114   : > { %6271 = vmatprep.mubr.msk.bf16.mxu1 %vm337_vm1, %v1902_v50  ;;  %6437 = vmatprep.mubr.msk.bf16.mxu0 %vm337_vm1, %v4703_v55  ;;  %v2516_v50 = vrot.slane %v2514_v42, 1  ;;  %v2525_v55 = vrot.slane %v2523_v36, 1  ;;  %v2532_v61 = vshrl.u32 %v6947_v52, 16  ;;  %v4732_v57 = vrot.slane %v6953_v37, 3 }
 0x115   : > { %v2512_v54 = vsel %vm2387_vm2, %v2502_v41, %v2511_v46 }
 0x116   : > { %v2520_v60 = vor.u32 %v2519_v51, %v2516_v50  ;;  %v2534_v8 = vrot.slane %v2532_v61, 1 }
 0x118   : > { %v2521_v6 = vsel %vm2387_vm2, %v2511_v46, %v2520_v60 }
 0x11b   : > { %6272 = vmatmul.mubr.msk.bf16.gmra.mrb[24].mxu1 %vm337_vm1, %v1904_v40  ;;  %6438 = vmatmul.mubr.msk.bf16.vlgmr.msra.gmra.mrb[0].mxu0 %vm337_vm1, %v4705_v1  ;;  %v6942_v40 = vld [vmem:[%s7026_s28 + $0x60] sm:$0xff]   ;;  %v2529_v1 = vor.u32 %v2528_v56, %v2525_v55 }
 0x11c   : > { %6275 = vmatprep.mubr.msk.bf16.mxu1 %vm337_vm1, %v1906_v62  ;;  %6441 = vmatprep.mubr.msk.bf16.mxu0 %vm337_vm1, %v4707_v5  ;;  %v2535_v62 = vshll.u32 %v6947_v52, 16  ;;  %v4720_v5 = vrot.slane %v6942_v40, 3  ;;  %v5191_v56 = vpop.permute.xlu0 %5190  ;;  %v5201_v40 = vpop.permute.xlu1 %5200 }
 0x11e   : > { %v2537_v9 = vrot.slane %v2535_v62, 2  ;;  %v4721_v15 = vsel %vm4700_vm7, %v4718_v53, %v4720_v5 }
 0x120   : > { %v2538_v16 = vor.u32 %v2537_v9, %v2534_v8 }
 0x122   : > { %v2539_v23 = vsel %vm2387_vm2, %v2529_v1, %v2538_v16  ;;  %v2548_v26 = vsel %vm2387_vm2, %v2538_v16, %v2547_v20 }
 0x123   : > { %6276 = vmatmul.mubr.msk.bf16.gmra.mrb[28].mxu1 %vm337_vm1, %v1908_v12  ;;  %6442 = vmatmul.mubr.msk.bf16.gmra.mrb[4].mxu0 %vm337_vm1, %v4709_v18  ;;  %v2530_v12 = vsel %vm2387_vm2, %v2520_v60, %v2529_v1  ;;  %v4723_v18 = vsel %vm4700_vm7, %v4720_v5, %v4722_v11  ;;  %v5196_v60 = vpop.permute.xlu0 %5195 }
 0x124   : > { %6279 = vmatprep.mubr.msk.bf16.mxu1 %vm337_vm1, %v1910_v38  ;;  %6445 = vmatprep.mubr.msk.bf16.mxu0 %vm337_vm1, %v4711_v3  ;;  %v6946_v38 = vld [vmem:[%s7026_s28 + $0x70] sm:$0xff]   ;;  %v2552_v3 = vrot.slane %v2550_v22, 1 }
 0x125   : > { %v4724_v21 = vrot.slane %v6946_v38, 3  ;;  %v5206_v0 = vpop.permute.xlu1 %5205 }
 0x127   : > { %v4725_v27 = vsel %vm4700_vm7, %v4722_v11, %v4724_v21  ;;  %v4727_v30 = vsel %vm4700_vm7, %v4724_v21, %v4726_v25  ;;  %v5211_v2 = vpop.permute.xlu0 %5210 }
 0x129   : > { %v5216_v5 = vpop.permute.xlu1 %5215 }
 0x12b   : > { %6280 = vmatmul.mubr.msk.bf16.gmra.mrb[32].mxu1 %vm337_vm1, %v1912_v29  ;;  %6446 = vmatmul.mubr.msk.bf16.gmra.mrb[8].mxu0 %vm337_vm1, %v4713_v7  ;;  %v2556_v29 = vor.u32 %v2555_v24, %v2552_v3  ;;  %v6954_v7 = vld [vmem:[%s7026_s28 + $0x98] sm:$0xff]   ;;  %v5221_v10 = vpop.permute.xlu0 %5220  ;;  %s6774_s28 = smul.u32 288, %s7858_s16 }
 0x12c   : > { %6305 = vmatprep.mubr.msk.bf16.mxu1 %vm337_vm1, %v2494_v34  ;;  %6449 = vmatprep.mubr.msk.bf16.mxu0 %vm337_vm1, %v4715_v44  ;;  %v4730_v34 = vrot.slane %v6952_v31, 3  ;;  %v4734_v41 = vrot.slane %v6954_v7, 3 }
 0x12d   : > { %v2557_v33 = vsel %vm2387_vm2, %v2547_v20, %v2556_v29  ;;  %v5226_v11 = vpop.permute.xlu1 %5225  ;;  %s7712_s22 = scalar_lea.vmem %s7855_s3, %s6774_s28 }
 0x12e   : > { %v4731_v39 = vsel %vm4700_vm7, %v4728_v32, %v4730_v34  ;;  %v4733_v42 = vsel %vm4700_vm7, %v4730_v34, %v4732_v57  ;;  %v4735_v44 = vsel %vm4700_vm7, %v4732_v57, %v4734_v41  ;;  %v4737_v46 = vsel %vm4700_vm7, %v4734_v41, %v4736_v45 }
 0x131   : > { %v7702_v13 = vpop.permute.xlu1 %5235 }
 0x133   : > { %6306 = vmatmul.mubr.msk.bf16.vlgmr.msra.gmra.mrb[20].mxu1 %vm337_vm1, %v2503_v49  ;;  %6450 = vmatmul.mubr.msk.bf16.gmra.mrb[12].mxu0 %vm337_vm1, %v4717_v59 }
 0x134   : > { %6309 = vmatprep.mubr.msk.bf16.mxu1 %vm337_vm1, %v2512_v54  ;;  %6453 = vmatprep.mubr.msk.bf16.mxu0 %vm337_vm1, %v4719_v63 }
 0x13b   : > { %6310 = vmatmul.mubr.msk.bf16.gmra.mrb[24].mxu1 %vm337_vm1, %v2521_v6  ;;  %6454 = vmatmul.mubr.msk.bf16.gmra.mrb[16].mxu0 %vm337_vm1, %v4721_v15  ;;  %v7707_v15 = vpop.permute.xlu1 %5245 }
 0x13c   : > { %6313 = vmatprep.mubr.msk.bf16.mxu1 %vm337_vm1, %v2530_v12  ;;  %6457 = vmatprep.mubr.msk.bf16.mxu0 %vm337_vm1, %v4723_v18  ;;  %v7700_v12 = vpop.permute.xlu0 %5230 }
 0x140   : > { %v7704_v14 = vpop.permute.xlu0 %5240 }
 0x143   : > { %6314 = vmatmul.mubr.msk.bf16.gmra.mrb[28].mxu1 %vm337_vm1, %v2539_v23  ;;  %6458 = vmatmul.mubr.msk.bf16.gmra.mrb[20].mxu0 %vm337_vm1, %v4725_v27 }
 0x144   : > { %6317 = vmatprep.mubr.msk.bf16.mxu1 %vm337_vm1, %v2548_v26  ;;  %6461 = vmatprep.mubr.msk.bf16.mxu0 %vm337_vm1, %v4727_v30  ;;  %v7714_v17 = vpop.permute.xlu0 %5250  ;;  %v7718_v24 = vpop.permute.xlu1 %5255 }
 0x148   : > { %v7722_v28 = vpop.permute.xlu0 %5260  ;;  %v7724_v41 = vpop.permute.xlu1 %5265 }
 0x14b   : > { %6318 = vmatmul.mubr.msk.bf16.gmra.mrb[32].mxu1 %vm337_vm1, %v2557_v33  ;;  %6462 = vmatmul.mubr.msk.bf16.gmra.mrb[24].mxu0 %vm337_vm1, %v4729_v35 }
 0x14c   : > { %6465 = vmatprep.mubr.msk.bf16.mxu0 %vm337_vm1, %v4731_v39 }
 0x153   : > { %6466 = vmatmul.mubr.msk.bf16.gmra.mrb[28].mxu0 %vm337_vm1, %v4733_v42 }
 0x154   : > { %6469 = vmatprep.mubr.msk.bf16.mxu0 %vm337_vm1, %v4735_v44 }
 0x15b   : > { %6470 = vmatmul.mubr.msk.bf16.gmra.mrb[32].mxu0 %vm337_vm1, %v4737_v46 }
 0x1be   : > { %v6249_v36 = vpop.f32.mrb[0].mxu1 }
 0x1bf   : > { %v2004_v47 = vpop.f32.mrb[1].mxu1 }
 0x1c0   : > { %v6250_v48 = vpop.f32.mrb[2].mxu1 }
 0x1c1   : > { %v2007_v49 = vpop.f32.mrb[3].mxu1 }
 0x1c6   : > { %v6253_v50 = vpop.f32.mrb[4].mxu1 }
 0x1c7   : > { %v2020_v51 = vpop.f32.mrb[5].mxu1 }
 0x1c8   : > { %v6254_v52 = vpop.f32.mrb[6].mxu1 }
 0x1c9   : > { %v7674_v53 = vpop.f32.mrb[7].mxu1 }
 0x1ce   : > { %v7676_v54 = vpop.f32.mrb[8].mxu1 }
 0x1cf   : > { %v7678_v55 = vpop.f32.mrb[9].mxu1 }
 0x1d0   : > { %v7680_v58 = vpop.f32.mrb[10].mxu1 }
 0x1d1   : > { %v7682_v59 = vpop.f32.mrb[11].mxu1 }
 0x1d6   : > { %v7684_v61 = vpop.f32.mrb[12].mxu1 }
 0x1d7   : > { %v7686_v62 = vpop.f32.mrb[13].mxu1 }
 0x1d8   : > { %v7688_v63 = vpop.f32.mrb[14].mxu1 }
 0x1d9   : > { %v7690_v1 = vpop.f32.mrb[15].mxu1 }
 0x1de   : > { %v7692_v4 = vpop.f32.mrb[16].mxu1 }
 0x1df   : > { %v7694_v6 = vpop.f32.mrb[17].mxu1 }
 0x1e0   : > { %v7696_v8 = vpop.f32.mrb[18].mxu1 }
 0x1e1   : > { %v7698_v9 = vpop.f32.mrb[19].mxu1 }
 0x1ee   : > { %v6439_v38 = vpop.f32.mrb[0].mxu0 }
 0x1ef   : > { %v6475_v16 = vadd.f32 %v6439_v38, %v6249_v36  ;;  %v4829_v22 = vpop.f32.mrb[1].mxu0 }
 0x1f0   : > { %v6476_v18 = vadd.f32 %v4829_v22, %v2004_v47  ;;  %v6440_v19 = vpop.f32.mrb[2].mxu0 }
 0x1f1   : > { %5118 = vst [vmem:[%s7712_s22 + $0x10] sm:$0xff] %v6475_v16  ;;  %v6477_v20 = vadd.f32 %v6440_v19, %v6250_v48  ;;  %v4832_v21 = vpop.f32.mrb[3].mxu0  ;;  %v5370_v25 = vmul.f32 %v6475_v16, %v5201_v40 }
 0x1f2   : > { %5116 = vst [vmem:[%s7712_s22] sm:$0xff] %v6476_v18  ;;  %v5368_v23 = vmul.f32 %v6476_v18, %v5191_v56  ;;  %v6478_v3 = vadd.f32 %v4832_v21, %v2007_v49  ;;  %v7730_v49 = vpop.permute.xlu0 %5270 }
 0x1f3   : > { %5119 = vst [vmem:[%s7712_s22 + $0x18] sm:$0xff] %v6477_v20  ;;  %v5371_v27 = vmul.f32 %v6477_v20, %v5206_v0  ;;  %v5448_v35 = vmul.f32 %v6475_v16, %v5370_v25 }
 0x1f4   : > { %5117 = vst [vmem:[%s7712_s22 + $0x8] sm:$0xff] %v6478_v3  ;;  %v5369_v26 = vmul.f32 %v6478_v3, %v5196_v60  ;;  %v5446_v29 = vmul.f32 %v6476_v18, %v5368_v23 }
 0x1f5   : > { %v5449_v42 = vmul.f32 %v6477_v20, %v5371_v27 }
 0x1f6   : > { %v5404_v30 = vadd.f32 %v5369_v26, %v5368_v23  ;;  %v5447_v31 = vmul.f32 %v6478_v3, %v5369_v26  ;;  %v6443_v32 = vpop.f32.mrb[4].mxu0  ;;  %v7739_v3 = vpop.permute.xlu0 %5280 }
 0x1f7   : > { %v6479_v33 = vadd.f32 %v6443_v32, %v6253_v50  ;;  %v4845_v34 = vpop.f32.mrb[5].mxu0 }
 0x1f8   : > { %v5405_v37 = vadd.f32 %v5404_v30, %v5370_v25  ;;  %v5482_v39 = vadd.f32 %v5447_v31, %v5446_v29  ;;  %v6480_v7 = vadd.f32 %v4845_v34, %v2020_v51  ;;  %v6444_v57 = vpop.f32.mrb[6].mxu0 }
 0x1f9   : > { %5122 = vst [vmem:[%s7712_s22 + $0x30] sm:$0xff] %v6479_v33  ;;  %v6481_v43 = vadd.f32 %v6444_v57, %v6254_v52  ;;  %v4848_v44 = vpop.f32.mrb[7].mxu0  ;;  %v5374_v48 = vmul.f32 %v6479_v33, %v5221_v10 }
 0x1fa   : > { %v5483_v45 = vadd.f32 %v5482_v39, %v5448_v35  ;;  %5120 = vst [vmem:[%s7712_s22 + $0x20] sm:$0xff] %v6480_v7  ;;  %v5372_v46 = vmul.f32 %v6480_v7, %v5211_v2  ;;  %v5406_v36 = vadd.f32 %v5405_v37, %v5371_v27  ;;  %v6482_v47 = vadd.f32 %v4848_v44, %v7674_v53  ;;  %v7733_v2 = vpop.permute.xlu1 %5275 }
 0x1fb   : > { %5123 = vst [vmem:[%s7712_s22 + $0x38] sm:$0xff] %v6481_v43  ;;  %v5375_v60 = vmul.f32 %v6481_v43, %v5226_v11  ;;  %v5452_v22 = vmul.f32 %v6479_v33, %v5374_v48 }
 0x1fc   : > { %v5407_v50 = vadd.f32 %v5406_v36, %v5372_v46  ;;  %v5450_v51 = vmul.f32 %v6480_v7, %v5372_v46  ;;  %v5484_v56 = vadd.f32 %v5483_v45, %v5449_v42  ;;  %5121 = vst [vmem:[%s7712_s22 + $0x28] sm:$0xff] %v6482_v47  ;;  %v5373_v40 = vmul.f32 %v6482_v47, %v5216_v5 }
 0x1fd   : > { %v5453_v23 = vmul.f32 %v6481_v43, %v5375_v60  ;;  %v7760_v43 = vpop.permute.xlu0 %5290 }
 0x1fe   : > { %v5485_v0 = vadd.f32 %v5484_v56, %v5450_v51  ;;  %v5408_v52 = vadd.f32 %v5407_v50, %v5373_v40  ;;  %v5451_v38 = vmul.f32 %v6482_v47, %v5373_v40  ;;  %v6447_v16 = vpop.f32.mrb[8].mxu0  ;;  %v7754_v35 = vpop.permute.xlu1 %5285 }
 0x1ff   : > { %v6483_v53 = vadd.f32 %v6447_v16, %v7676_v54  ;;  %v4861_v10 = vpop.f32.mrb[9].mxu0 }
 0x200   : > { %v5409_v18 = vadd.f32 %v5408_v52, %v5374_v48  ;;  %v5486_v19 = vadd.f32 %v5485_v0, %v5451_v38  ;;  %v6484_v20 = vadd.f32 %v4861_v10, %v7678_v55  ;;  %v6448_v21 = vpop.f32.mrb[10].mxu0 }
 0x201   : > { %5126 = vst [vmem:[%s7712_s22 + $0x50] sm:$0xff] %v6483_v53  ;;  %v6485_v5 = vadd.f32 %v6448_v21, %v7680_v58  ;;  %v4864_v11 = vpop.f32.mrb[11].mxu0  ;;  %v5378_v55 = vmul.f32 %v6483_v53, %v7704_v14  ;;  %v5301_v10 = vpop.permute.xlu0 %5300 }
 0x202   : > { %v5487_v25 = vadd.f32 %v5486_v19, %v5452_v22  ;;  %5124 = vst [vmem:[%s7712_s22 + $0x40] sm:$0xff] %v6484_v20  ;;  %v5376_v54 = vmul.f32 %v6484_v20, %v7700_v12  ;;  %v5410_v26 = vadd.f32 %v5409_v18, %v5375_v60  ;;  %v6486_v27 = vadd.f32 %v4864_v11, %v7682_v59  ;;  %v7770_v60 = vpop.permute.xlu1 %5295 }
 0x203   : > { %5127 = vst [vmem:[%s7712_s22 + $0x58] sm:$0xff] %v6485_v5  ;;  %v5379_v59 = vmul.f32 %v6485_v5, %v7707_v15 }
 0x204   : > { %v5411_v31 = vadd.f32 %v5410_v26, %v5376_v54  ;;  %v5454_v32 = vmul.f32 %v6484_v20, %v5376_v54  ;;  %v5488_v58 = vadd.f32 %v5487_v25, %v5453_v23  ;;  %5125 = vst [vmem:[%s7712_s22 + $0x48] sm:$0xff] %v6486_v27  ;;  %v5377_v33 = vmul.f32 %v6486_v27, %v7702_v13 }
 0x205   : > { %v5456_v13 = vmul.f32 %v6483_v53, %v5378_v55  ;;  %v5457_v15 = vmul.f32 %v6485_v5, %v5379_v59 }
 0x206   : > { %v7744_v29 = vpop.f32.mrb[20].mxu1  ;;  %v5489_v37 = vadd.f32 %v5488_v58, %v5454_v32  ;;  %v5412_v14 = vadd.f32 %v5411_v31, %v5377_v33  ;;  %v5455_v39 = vmul.f32 %v6486_v27, %v5377_v33  ;;  %v6451_v7 = vpop.f32.mrb[12].mxu0 }
 0x207   : > { %v7748_v30 = vpop.f32.mrb[21].mxu1  ;;  %v6487_v57 = vadd.f32 %v6451_v7, %v7684_v61  ;;  %v4877_v42 = vpop.f32.mrb[13].mxu0 }
 0x208   : > { %v7752_v34 = vpop.f32.mrb[22].mxu1  ;;  %v5413_v44 = vadd.f32 %v5412_v14, %v5378_v55  ;;  %v5490_v45 = vadd.f32 %v5489_v37, %v5455_v39  ;;  %v6488_v46 = vadd.f32 %v4877_v42, %v7686_v62  ;;  %v6452_v36 = vpop.f32.mrb[14].mxu0 }
 0x209   : > { %v7757_v12 = vpop.f32.mrb[23].mxu1  ;;  %5130 = vst [vmem:[%s7712_s22 + $0x70] sm:$0xff] %v6487_v57  ;;  %v6489_v47 = vadd.f32 %v6452_v36, %v7688_v63  ;;  %v4880_v48 = vpop.f32.mrb[15].mxu0  ;;  %v5382_v62 = vmul.f32 %v6487_v57, %v7722_v28 }
 0x20a   : > { %v5491_v50 = vadd.f32 %v5490_v45, %v5456_v13  ;;  %5128 = vst [vmem:[%s7712_s22 + $0x60] sm:$0xff] %v6488_v46  ;;  %v5380_v61 = vmul.f32 %v6488_v46, %v7714_v17  ;;  %v5414_v51 = vadd.f32 %v5413_v44, %v5379_v59  ;;  %v6490_v56 = vadd.f32 %v4880_v48, %v7690_v1  ;;  %v5311_v59 = vpop.permute.xlu0 %5310 }
 0x20b   : > { %5131 = vst [vmem:[%s7712_s22 + $0x78] sm:$0xff] %v6489_v47  ;;  %v5383_v17 = vmul.f32 %v6489_v47, %v7724_v41  ;;  %v5460_v23 = vmul.f32 %v6487_v57, %v5382_v62  ;;  %v5306_v41 = vpop.permute.xlu1 %5305 }
 0x20c   : > { %v5415_v52 = vadd.f32 %v5414_v51, %v5380_v61  ;;  %v5458_v38 = vmul.f32 %v6488_v46, %v5380_v61  ;;  %v5492_v63 = vadd.f32 %v5491_v50, %v5457_v15  ;;  %5129 = vst [vmem:[%s7712_s22 + $0x68] sm:$0xff] %v6490_v56  ;;  %v5381_v16 = vmul.f32 %v6490_v56, %v7718_v24 }
 0x20d   : > { %v5461_v54 = vmul.f32 %v6489_v47, %v5383_v17 }
 0x20e   : > { %v7768_v40 = vpop.f32.mrb[24].mxu1  ;;  %v5493_v22 = vadd.f32 %v5492_v63, %v5458_v38  ;;  %v5416_v18 = vadd.f32 %v5415_v52, %v5381_v16  ;;  %v5459_v28 = vmul.f32 %v6490_v56, %v5381_v16  ;;  %v6455_v19 = vpop.f32.mrb[16].mxu0 }
 0x20f   : > { %v7774_v0 = vpop.f32.mrb[25].mxu1  ;;  %v6491_v20 = vadd.f32 %v6455_v19, %v7692_v4  ;;  %v4893_v21 = vpop.f32.mrb[17].mxu0 }
 0x210   : > { %v7778_v53 = vpop.f32.mrb[26].mxu1  ;;  %v5417_v5 = vadd.f32 %v5416_v18, %v5382_v62  ;;  %v5494_v24 = vadd.f32 %v5493_v22, %v5459_v28  ;;  %v6492_v11 = vadd.f32 %v4893_v21, %v7694_v6  ;;  %v6456_v25 = vpop.f32.mrb[18].mxu0 }
 0x211   : > { %v7781_v1 = vpop.f32.mrb[27].mxu1  ;;  %5134 = vst [vmem:[%s7712_s22 + $0x90] sm:$0xff] %v6491_v20  ;;  %v6493_v26 = vadd.f32 %v6456_v25, %v7696_v8  ;;  %v4896_v27 = vpop.f32.mrb[19].mxu0  ;;  %v5386_v33 = vmul.f32 %v6491_v20, %v7739_v3 }
 0x212   : > { %v5495_v55 = vadd.f32 %v5494_v24, %v5460_v23  ;;  %5132 = vst [vmem:[%s7712_s22 + $0x80] sm:$0xff] %v6492_v11  ;;  %v5384_v31 = vmul.f32 %v6492_v11, %v7730_v49  ;;  %v5418_v4 = vadd.f32 %v5417_v5, %v5383_v17  ;;  %v6494_v32 = vadd.f32 %v4896_v27, %v7698_v9  ;;  %v5316_v44 = vpop.permute.xlu1 %5315  ;;  %v5321_v51 = vpop.permute.xlu0 %5320 }
 0x213   : > { %5135 = vst [vmem:[%s7712_s22 + $0x98] sm:$0xff] %v6493_v26  ;;  %v5387_v49 = vmul.f32 %v6493_v26, %v7754_v35  ;;  %v5464_v36 = vmul.f32 %v6491_v20, %v5386_v33 }
 0x214   : > { %v5419_v37 = vadd.f32 %v5418_v4, %v5384_v31  ;;  %v5462_v14 = vmul.f32 %v6492_v11, %v5384_v31  ;;  %v5496_v39 = vadd.f32 %v5495_v55, %v5461_v54  ;;  %5133 = vst [vmem:[%s7712_s22 + $0x88] sm:$0xff] %v6494_v32  ;;  %v5385_v8 = vmul.f32 %v6494_v32, %v7733_v2 }
 0x215   : > { %v5465_v50 = vmul.f32 %v6493_v26, %v5387_v49 }
 0x216   : > { %v7790_v58 = vpop.f32.mrb[28].mxu1  ;;  %v5497_v57 = vadd.f32 %v5496_v39, %v5462_v14  ;;  %v5420_v42 = vadd.f32 %v5419_v37, %v5385_v8  ;;  %v5463_v3 = vmul.f32 %v6494_v32, %v5385_v8  ;;  %v6459_v13 = vpop.f32.mrb[20].mxu0 }
 0x217   : > { %v7794_v6 = vpop.f32.mrb[29].mxu1  ;;  %v6495_v45 = vadd.f32 %v6459_v13, %v7744_v29  ;;  %v4909_v46 = vpop.f32.mrb[21].mxu0 }
 0x218   : > { %v7798_v7 = vpop.f32.mrb[30].mxu1  ;;  %v5421_v15 = vadd.f32 %v5420_v42, %v5386_v33  ;;  %v5498_v2 = vadd.f32 %v5497_v57, %v5463_v3  ;;  %v6496_v47 = vadd.f32 %v4909_v46, %v7748_v30  ;;  %v6460_v48 = vpop.f32.mrb[22].mxu0 }
 0x219   : > { %v7801_v9 = vpop.f32.mrb[31].mxu1  ;;  %5138 = vst [vmem:[%s7712_s22 + $0xb0] sm:$0xff] %v6495_v45  ;;  %v6497_v35 = vadd.f32 %v6460_v48, %v7752_v34  ;;  %v4912_v61 = vpop.f32.mrb[23].mxu0  ;;  %v5390_v63 = vmul.f32 %v6495_v45, %v5301_v10 }
 0x21a   : > { %v5499_v56 = vadd.f32 %v5498_v2, %v5464_v36  ;;  %5136 = vst [vmem:[%s7712_s22 + $0xa0] sm:$0xff] %v6496_v47  ;;  %v5388_v62 = vmul.f32 %v6496_v47, %v7760_v43  ;;  %v5422_v29 = vadd.f32 %v5421_v15, %v5387_v49  ;;  %v6498_v52 = vadd.f32 %v4912_v61, %v7757_v12  ;;  %v5326_v28 = vpop.permute.xlu1 %5325  ;;  %v5331_v24 = vpop.permute.xlu0 %5330 }
 0x21b   : > { %5139 = vst [vmem:[%s7712_s22 + $0xb8] sm:$0xff] %v6497_v35  ;;  %v5391_v43 = vmul.f32 %v6497_v35, %v5306_v41  ;;  %v5468_v11 = vmul.f32 %v6495_v45, %v5390_v63 }
 0x21c   : > { %v5423_v16 = vadd.f32 %v5422_v29, %v5388_v62  ;;  %v5466_v17 = vmul.f32 %v6496_v47, %v5388_v62  ;;  %v5500_v22 = vadd.f32 %v5499_v56, %v5465_v50  ;;  %5137 = vst [vmem:[%s7712_s22 + $0xa8] sm:$0xff] %v6498_v52  ;;  %v5389_v34 = vmul.f32 %v6498_v52, %v7770_v60 }
 0x21d   : > { %v5469_v41 = vmul.f32 %v6497_v35, %v5391_v43 }
 0x21e   : > { %v7810_v38 = vpop.f32.mrb[32].mxu1  ;;  %v5501_v12 = vadd.f32 %v5500_v22, %v5466_v17  ;;  %v5424_v20 = vadd.f32 %v5423_v16, %v5389_v34  ;;  %v5467_v10 = vmul.f32 %v6498_v52, %v5389_v34  ;;  %v6463_v21 = vpop.f32.mrb[24].mxu0 }
 0x21f   : > { %v7813_v30 = vpop.f32.mrb[33].mxu1  ;;  %v6499_v23 = vadd.f32 %v6463_v21, %v7768_v40  ;;  %v4925_v5 = vpop.f32.mrb[25].mxu0 }
 0x220   : > { %v7817_v18 = vpop.f32.mrb[34].mxu1  ;;  %v5425_v25 = vadd.f32 %v5424_v20, %v5390_v63  ;;  %v5502_v60 = vadd.f32 %v5501_v12, %v5467_v10  ;;  %v6500_v54 = vadd.f32 %v4925_v5, %v7774_v0  ;;  %v6464_v26 = vpop.f32.mrb[26].mxu0 }
 0x221   : > { %v7819_v19 = vpop.f32.mrb[35].mxu1  ;;  %5142 = vst [vmem:[%s7712_s22 + $0xd0] sm:$0xff] %v6499_v23  ;;  %v6501_v27 = vadd.f32 %v6464_v26, %v7778_v53  ;;  %v4928_v55 = vpop.f32.mrb[27].mxu0  ;;  %v5394_v37 = vmul.f32 %v6499_v23, %v5321_v51 }
 0x222   : > { %v5503_v31 = vadd.f32 %v5502_v60, %v5468_v11  ;;  %5140 = vst [vmem:[%s7712_s22 + $0xc0] sm:$0xff] %v6500_v54  ;;  %v5392_v4 = vmul.f32 %v6500_v54, %v5311_v59  ;;  %v5426_v32 = vadd.f32 %v5425_v25, %v5391_v43  ;;  %v6502_v40 = vadd.f32 %v4928_v55, %v7781_v1  ;;  %v5336_v33 = vpop.permute.xlu1 %5335  ;;  %v5341_v57 = vpop.permute.xlu0 %5340 }
 0x223   : > { %5143 = vst [vmem:[%s7712_s22 + $0xd8] sm:$0xff] %v6501_v27  ;;  %v5395_v49 = vmul.f32 %v6501_v27, %v5326_v28  ;;  %v5472_v1 = vmul.f32 %v6499_v23, %v5394_v37 }
 0x224   : > { %v5427_v14 = vadd.f32 %v5426_v32, %v5392_v4  ;;  %v5470_v39 = vmul.f32 %v6500_v54, %v5392_v4  ;;  %v5504_v8 = vadd.f32 %v5503_v31, %v5469_v41  ;;  %5141 = vst [vmem:[%s7712_s22 + $0xc8] sm:$0xff] %v6502_v40  ;;  %v5393_v0 = vmul.f32 %v6502_v40, %v5316_v44 }
 0x225   : > { %v5473_v44 = vmul.f32 %v6501_v27, %v5395_v49 }
 0x226   : > { %v5505_v42 = vadd.f32 %v5504_v8, %v5470_v39  ;;  %v5428_v53 = vadd.f32 %v5427_v14, %v5393_v0  ;;  %v5471_v3 = vmul.f32 %v6502_v40, %v5393_v0  ;;  %v6467_v13 = vpop.f32.mrb[28].mxu0  ;;  %v5346_v47 = vpop.permute.xlu1 %5345 }
 0x227   : > { %v6503_v59 = vadd.f32 %v6467_v13, %v7790_v58  ;;  %v4941_v45 = vpop.f32.mrb[29].mxu0  ;;  %v5351_v62 = vpop.permute.xlu0 %5350 }
 0x228   : > { %v5429_v46 = vadd.f32 %v5428_v53, %v5394_v37  ;;  %v5506_v36 = vadd.f32 %v5505_v42, %v5471_v3  ;;  %v6504_v15 = vadd.f32 %v4941_v45, %v7794_v6  ;;  %v6468_v2 = vpop.f32.mrb[30].mxu0 }
 0x229   : > { %5146 = vst [vmem:[%s7712_s22 + $0xf0] sm:$0xff] %v6503_v59  ;;  %v6505_v48 = vadd.f32 %v6468_v2, %v7798_v7  ;;  %v4944_v50 = vpop.f32.mrb[31].mxu0  ;;  %v5398_v56 = vmul.f32 %v6503_v59, %v5341_v57 }
 0x22a   : > { %v5507_v35 = vadd.f32 %v5506_v36, %v5472_v1  ;;  %5144 = vst [vmem:[%s7712_s22 + $0xe0] sm:$0xff] %v6504_v15  ;;  %v5396_v61 = vmul.f32 %v6504_v15, %v5331_v24  ;;  %v5430_v51 = vadd.f32 %v5429_v46, %v5395_v49  ;;  %v6506_v58 = vadd.f32 %v4944_v50, %v7801_v9  ;;  %v5356_v28 = vpop.permute.xlu1 %5355 }
 0x22b   : > { %5147 = vst [vmem:[%s7712_s22 + $0xf8] sm:$0xff] %v6505_v48  ;;  %v5399_v16 = vmul.f32 %v6505_v48, %v5346_v47  ;;  %v5476_v9 = vmul.f32 %v6503_v59, %v5398_v56  ;;  %v5361_v25 = vpop.permute.xlu0 %5360 }
 0x22c   : > { %v5431_v29 = vadd.f32 %v5430_v51, %v5396_v61  ;;  %v5474_v52 = vmul.f32 %v6504_v15, %v5396_v61  ;;  %v5508_v6 = vadd.f32 %v5507_v35, %v5473_v44  ;;  %5145 = vst [vmem:[%s7712_s22 + $0xe8] sm:$0xff] %v6506_v58  ;;  %v5397_v63 = vmul.f32 %v6506_v58, %v5336_v33 }
 0x22d   : > { %v5477_v5 = vmul.f32 %v6505_v48, %v5399_v16 }
 0x22e   : > { %v5509_v17 = vadd.f32 %v5508_v6, %v5474_v52  ;;  %v5432_v22 = vadd.f32 %v5431_v29, %v5397_v63  ;;  %v5475_v7 = vmul.f32 %v6506_v58, %v5397_v63  ;;  %v6471_v34 = vpop.f32.mrb[32].mxu0  ;;  %v5366_v4 = vpop.permute.xlu1 %5365 }
 0x22f   : > { %v6507_v43 = vadd.f32 %v6471_v34, %v7810_v38  ;;  %v4957_v12 = vpop.f32.mrb[33].mxu0 }
 0x230   : > { %v5433_v20 = vadd.f32 %v5432_v22, %v5398_v56  ;;  %v5510_v10 = vadd.f32 %v5509_v17, %v5475_v7  ;;  %v6508_v21 = vadd.f32 %v4957_v12, %v7813_v30  ;;  %v6472_v23 = vpop.f32.mrb[34].mxu0 }
 0x231   : > { %5150 = vst [vmem:[%s7712_s22 + $0x110] sm:$0xff] %v6507_v43  ;;  %v6509_v24 = vadd.f32 %v6472_v23, %v7817_v18  ;;  %v4960_v11 = vpop.f32.mrb[35].mxu0  ;;  %v5402_v41 = vmul.f32 %v6507_v43, %v5361_v25 }
 0x232   : > { %v5511_v60 = vadd.f32 %v5510_v10, %v5476_v9  ;;  %5148 = vst [vmem:[%s7712_s22 + $0x100] sm:$0xff] %v6508_v21  ;;  %v5400_v54 = vmul.f32 %v6508_v21, %v5351_v62  ;;  %v5434_v26 = vadd.f32 %v5433_v20, %v5399_v16  ;;  %v6510_v38 = vadd.f32 %v4960_v11, %v7819_v19 }
 0x233   : > { %5151 = vst [vmem:[%s7712_s22 + $0x118] sm:$0xff] %v6509_v24  ;;  %v5403_v40 = vmul.f32 %v6509_v24, %v5366_v4  ;;  %v5480_v37 = vmul.f32 %v6507_v43, %v5402_v41 }
 0x234   : > { %v5435_v27 = vadd.f32 %v5434_v26, %v5400_v54  ;;  %v5478_v55 = vmul.f32 %v6508_v21, %v5400_v54  ;;  %v5512_v31 = vadd.f32 %v5511_v60, %v5477_v5  ;;  %5149 = vst [vmem:[%s7712_s22 + $0x108] sm:$0xff] %v6510_v38  ;;  %v5401_v30 = vmul.f32 %v6510_v38, %v5356_v28 }
 0x235   : > { %v5481_v8 = vmul.f32 %v6509_v24, %v5403_v40 }
 0x236   : > { %v5513_v32 = vadd.f32 %v5512_v31, %v5478_v55  ;;  %v5436_v18 = vadd.f32 %v5435_v27, %v5401_v30  ;;  %v5479_v33 = vmul.f32 %v6510_v38, %v5401_v30 }
 0x238   : > { %v5437_v14 = vadd.f32 %v5436_v18, %v5402_v41  ;;  %v5514_v39 = vadd.f32 %v5513_v32, %v5479_v33 }
 0x23a   : > { %v5438_v0 = vadd.f32 %v5437_v14, %v5403_v40  ;;  %v5515_v49 = vadd.f32 %v5514_v39, %v5480_v37 }
 0x23c   : > { %v5439_v19 = vrot.slane %v5438_v0, 4  ;;  %v5516_v57 = vadd.f32 %v5515_v49, %v5481_v8 }
 0x23e   : > { %v5440_v42 = vadd.f32 %v5439_v19, %v5438_v0  ;;  %v5517_v53 = vrot.slane %v5516_v57, 4 }
 0x240   : > { %v5441_v3 = vrot.slane %v5440_v42, 2  ;;  %v5518_v13 = vadd.f32 %v5517_v53, %v5516_v57 }
 0x242   : > { %v5442_v59 = vadd.f32 %v5441_v3, %v5440_v42  ;;  %v5519_v45 = vrot.slane %v5518_v13, 2 }
 0x244   : > { %v5443_v1 = vrot.slane %v5442_v59, 1  ;;  %v5520_v46 = vadd.f32 %v5519_v45, %v5518_v13 }
 0x246   : > { %v5444_v36 = vadd.f32 %v5443_v1, %v5442_v59  ;;  %v5521_v15 = vrot.slane %v5520_v46, 1 }
 0x248   : > { %5445 = vst [vmem:[%s208_s26] sm:$0x1] %v5444_v36  ;;  %v5522_v2 = vadd.f32 %v5521_v15, %v5520_v46 }
 0x24a   : > { %5523 = vst [vmem:[%s208_s26 + $0x1] sm:$0x1] %v5522_v2 }
 0x24b PF: > { %s15_s15 = sadd.s32 1, %s6963_s15  }
 0x24c   : > { %p12_p4 = scmp.ge.s32.totalorder %s15_s15, 4  }
 0x24e   :  { %14 = sbr.rel (!%p12_p4) target bundleno = 1 (0x1), region = 82 }

</bundles_post_ra>
